<compile_context>
chip_gen: v7x
topology: tpu7x:2x2x1
jax: 0.10.0
libtpu: 0.0.40
codegen_flags: <defaults>
</compile_context>

<pallas_src>
import functools
import math

import jax
import jax.numpy as jnp
from jax.experimental import pallas as pl
from jax.experimental.pallas import tpu as pltpu

# ---------------- model hyper-params (small, consistent with the module) -----
B = 2           # batch
L = 16          # sequence length
D_MODEL = 32    # d_model
N_HEADS = 4     # heads inside the attention sub-module
D_HEAD = D_MODEL // N_HEADS
D_FF = 4 * D_MODEL   # d_ff = 4 * d_model (default)
LN_EPS = 1e-5


def _layer_norm(t, gamma, beta):
    mu = jnp.mean(t, axis=-1, keepdims=True)
    var = jnp.mean((t - mu) * (t - mu), axis=-1, keepdims=True)
    return (t - mu) * jax.lax.rsqrt(var + LN_EPS) * gamma + beta


# ------------------------------- the kernel ----------------------------------
def encoder_layer_kernel(
    x_ref, wf_ref, w1_ref, w2_ref, bank_ref,
    out_ref, attn_ref=None,
    *, n_batch, seq_len, n_heads,
):
    x = x_ref[...]                                    # (B*L, D) flattened tokens
    d = x.shape[-1]
    dh = d // n_heads
    d_ff = w1_ref.shape[-1]
    wproj = wf_ref.shape[-1]                          # (H+2)*D

    # Bias/affine bank: one operand, sublane slices (prefix lane slices only).
    bank = bank_ref[...]                              # (8, width)
    bf  = bank[0:1, :wproj]                           # [bvo | bq*scale | bk]
    b1  = bank[1:2, :d_ff]
    bo  = bank[2:3, :d]
    g1  = bank[3:4, :d]
    be1 = bank[4:5, :d]
    b2  = bank[5:6, :d]
    g2  = bank[6:7, :d]
    be2 = bank[7:8, :d]

    # Fused projection: one MXU push gives U (=V@Wo per head), Q (pre-scaled), K.
    proj = jnp.dot(x, wf_ref[...], preferred_element_type=jnp.float32) + bf

    off_u = 0
    off_q = n_heads * d
    off_k = off_q + d

    o_rows = []                                       # per-batch attention output
    attn_cols = []                                    # per-(b,h) probs (lane concat)
    for b in range(n_batch):                          # static unroll (tiny)
        r0 = b * seq_len
        u_b = proj[r0:r0 + seq_len, off_u:off_u + n_heads * d]   # (L, H*D)
        q_b = proj[r0:r0 + seq_len, off_q:off_q + d]             # (L, D), pre-scaled
        # ONE transpose per batch; heads become 8-aligned sublane slices of kT_b.
        kT_b = proj[r0:r0 + seq_len, off_k:off_k + d].T          # (D, L)
        o_b = None
        for h in range(n_heads):                      # static unroll (tiny)
            c0 = h * dh
            s = jnp.dot(q_b[:, c0:c0 + dh], kT_b[c0:c0 + dh, :],
                        preferred_element_type=jnp.float32)      # (L, L)
            s = s - jnp.max(s, axis=-1, keepdims=True)
            p = jnp.exp(s)
            p = p / jnp.sum(p, axis=-1, keepdims=True)           # exact divide
            if attn_ref is not None:
                attn_cols.append(p)
            # Output projection already folded into U -> single 32-aligned slice.
            contrib = jnp.dot(p, u_b[:, h * d:(h + 1) * d],
                              preferred_element_type=jnp.float32)  # (L, D)
            o_b = contrib if o_b is None else o_b + contrib
        o_rows.append(o_b)

    new_x = jnp.concatenate(o_rows, axis=0) + bo      # (B*L, D)

    # ---- residual + LayerNorm1  (dropout == identity in eval mode) ----------
    xn = _layer_norm(x + new_x, g1, be1)

    # ---- position-wise FFN: conv1(k=1) -> relu -> conv2(k=1) ----------------
    y = jnp.dot(xn, w1_ref[...], preferred_element_type=jnp.float32) + b1
    y = jnp.maximum(y, 0.0)
    y = jnp.dot(y, w2_ref[...], preferred_element_type=jnp.float32) + b2

    # ---- residual + LayerNorm2, single full-block store ---------------------
    out_ref[...] = _layer_norm(xn + y, g2, be2)

    if attn_ref is not None:
        # Lane-dense (L, B*H*L) = (16, 128) slab -> one unmasked full store.
        attn_ref[...] = jnp.concatenate(attn_cols, axis=1)


# ------------------------- one-time parameter fusion --------------------------
def prepare_params(params, *, n_heads=N_HEADS):
    """Fuse/stack the 16 PyTorch tensors into 4 kernel operands. Run ONCE."""
    wq, bq, wk, bk, wv, bv, wo, bo, g1, be1, w1, b1, w2, b2, g2, be2 = params
    d = wq.shape[0]
    dh = d // n_heads
    scale = 1.0 / math.sqrt(dh)

    # Per-head V->O fusion:  U_h = x @ (Wv_h @ Wo_h) + (bv_h @ Wo_h)
    wvo = jnp.concatenate(
        [wv[:, h * dh:(h + 1) * dh] @ wo[h * dh:(h + 1) * dh, :]
         for h in range(n_heads)], axis=1)                       # (D, H*D)
    bvo = jnp.concatenate(
        [bv[:, h * dh:(h + 1) * dh] @ wo[h * dh:(h + 1) * dh, :]
         for h in range(n_heads)], axis=1)                       # (1, H*D)

    # Fused projection weight: [Wvo | Wq*scale | Wk]  (scale folded into Q).
    w_fused = jnp.concatenate([wvo, wq * scale, wk], axis=1)     # (D, (H+2)*D)
    b_fused = jnp.concatenate([bvo, bq * scale, bk], axis=1)     # (1, (H+2)*D)

    width = max(w_fused.shape[1], b1.shape[1])

    def pad(v):
        return jnp.pad(v, ((0, 0), (0, width - v.shape[1])))

    bank = jnp.concatenate(
        [pad(b_fused), pad(b1), pad(bo), pad(g1), pad(be1),
         pad(b2), pad(g2), pad(be2)], axis=0)                    # (8, width)

    return (w_fused, w1, w2, bank)


# --------------------------------- wrapper ------------------------------------
def encoder_layer(x, fused_params, *, n_heads=N_HEADS, output_attention=False):
    """x: (B, L, D) float32; fused_params from prepare_params().

    Returns out (B, L, D); additionally attn (B, H, L, L) when
    output_attention=True (Informer's default is False -> attn is dropped).
    """
    b, l, d = x.shape
    w_fused, w1, w2, bank = fused_params
    d_ff = w1.shape[1]
    wproj = w_fused.shape[1]

    x2 = x.reshape(b * l, d)                           # batch folded into rows (free)

    def full(shape):
        n = len(shape)
        return pl.BlockSpec(shape, lambda i: (0,) * n)

    in_specs = [
        full((b * l, d)),                              # x (flattened)
        full((d, wproj)),                              # fused [Wvo | Wq*s | Wk]
        full((d, d_ff)),                               # conv1 W
        full((d_ff, d)),                               # conv2 W
        full(bank.shape),                              # bias/affine bank
    ]
    out_specs = full((b * l, d))
    out_shape = jax.ShapeDtypeStruct((b * l, d), jnp.float32)
    if output_attention:
        out_specs = (out_specs, full((l, b * n_heads * l)))
        out_shape = (out_shape,
                     jax.ShapeDtypeStruct((l, b * n_heads * l), jnp.float32))

    kernel = functools.partial(encoder_layer_kernel,
                               n_batch=b, seq_len=l, n_heads=n_heads)
    # NOTE(v7x/scaling): at production B*L split rows over a "parallel" grid
    # axis (megacore) and tile rows to fit 64 MiB VMEM; at B*L=32 one step wins.
    res = pl.pallas_call(
        kernel,
        grid=(1,),
        in_specs=in_specs,
        out_specs=out_specs,
        out_shape=out_shape,
        compiler_params=pltpu.CompilerParams(dimension_semantics=("arbitrary",)),
    )(x2, w_fused, w1, w2, bank)

    if output_attention:
        out2, attn2 = res
        attn = attn2.reshape(l, b, n_heads, l).transpose(1, 2, 0, 3)
        return out2.reshape(b, l, d), attn
    return res.reshape(b, l, d)


# ----------------------------- pure-JAX reference -----------------------------
def encoder_layer_ref(x, params):
    wq, bq, wk, bk, wv, bv, wo, bo, g1, be1, w1, b1, w2, b2, g2, be2 = params

    def ln(t, g, bb):
        mu = jnp.mean(t, axis=-1, keepdims=True)
        var = jnp.mean((t - mu) ** 2, axis=-1, keepdims=True)
        return (t - mu) / jnp.sqrt(var + LN_EPS) * g + bb

    q = x @ wq + bq[0]
    k = x @ wk + bk[0]
    v = x @ wv + bv[0]
    qh = q.reshape(B, L, N_HEADS, D_HEAD)
    kh = k.reshape(B, L, N_HEADS, D_HEAD)
    vh = v.reshape(B, L, N_HEADS, D_HEAD)
    s = jnp.einsum("blhe,bshe->bhls", qh, kh) / math.sqrt(D_HEAD)
    a = jax.nn.softmax(s, axis=-1)
    o = jnp.einsum("bhls,bshd->blhd", a, vh).reshape(B, L, D_MODEL)
    new_x = o @ wo + bo[0]

    x1 = ln(x + new_x, g1[0], be1[0])
    y = jnp.maximum(x1 @ w1 + b1[0], 0.0) @ w2 + b2[0]
    return ln(x1 + y, g2[0], be2[0]), a


def make_params(key):
    ks = jax.random.split(key, 10)
    s = 0.1
    wq = jax.random.normal(ks[0], (D_MODEL, D_MODEL), jnp.float32) * s
    wk = jax.random.normal(ks[1], (D_MODEL, D_MODEL), jnp.float32) * s
    wv = jax.random.normal(ks[2], (D_MODEL, D_MODEL), jnp.float32) * s
    wo = jax.random.normal(ks[3], (D_MODEL, D_MODEL), jnp.float32) * s
    bq = jax.random.normal(ks[4], (1, D_MODEL), jnp.float32) * s
    bk = jax.random.normal(ks[8], (1, D_MODEL), jnp.float32) * s
    bv = jax.random.normal(ks[9], (1, D_MODEL), jnp.float32) * s
    bo = jax.random.normal(ks[5], (1, D_MODEL), jnp.float32) * s
    g1 = jnp.ones((1, D_MODEL), jnp.float32)
    be1 = jnp.zeros((1, D_MODEL), jnp.float32)
    w1 = jax.random.normal(ks[6], (D_MODEL, D_FF), jnp.float32) * s   # conv1 (k=1)
    b1 = jnp.full((1, D_FF), 0.01, jnp.float32)
    w2 = jax.random.normal(ks[7], (D_FF, D_MODEL), jnp.float32) * s   # conv2 (k=1)
    b2 = jnp.full((1, D_MODEL), 0.01, jnp.float32)
    g2 = jnp.ones((1, D_MODEL), jnp.float32)
    be2 = jnp.zeros((1, D_MODEL), jnp.float32)
    return (wq, bq, wk, bk, wv, bv, wo, bo, g1, be1, w1, b1, w2, b2, g2, be2)


if __name__ == "__main__":
    key = jax.random.PRNGKey(0)
    kx, kp = jax.random.split(key)
    x = jax.random.normal(kx, (B, L, D_MODEL), jnp.float32)
    params = make_params(kp)

    # One-time parameter fusion (outside the per-call path).
    fused = prepare_params(params)
    fused = tuple(jax.block_until_ready(t) for t in fused)

    ref_out, ref_attn = encoder_layer_ref(x, params)

    # Path 1: attention probabilities requested (output_attention=True).
    out, attn = encoder_layer(x, fused, output_attention=True)
    out = jax.block_until_ready(out)
    attn = jax.block_until_ready(attn)
    assert jnp.allclose(out, ref_out, atol=2e-3, rtol=2e-3), "output mismatch"
    assert jnp.allclose(attn, ref_attn, atol=2e-3, rtol=2e-3), "attn mismatch"

    # Path 2: Informer default (output_attention=False -> attn dropped).
    out2 = jax.block_until_ready(encoder_layer(x, fused))
    assert jnp.allclose(out2, ref_out, atol=2e-3, rtol=2e-3), "output mismatch (no attn)"

    print("KERNEL_OK")
</pallas_src>

<mosaic_0001>
module attributes {stable_mosaic.version = 11 : i64} {
  func.func @encoder_layer_kernel(%arg0: i32, %arg1: memref<32x32xf32, #tpu.memory_space<vmem>>, %arg2: memref<32x192xf32, #tpu.memory_space<vmem>>, %arg3: memref<32x128xf32, #tpu.memory_space<vmem>>, %arg4: memref<128x32xf32, #tpu.memory_space<vmem>>, %arg5: memref<8x192xf32, #tpu.memory_space<vmem>>, %arg6: memref<32x32xf32, #tpu.memory_space<vmem>>, %arg7: memref<16x128xf32, #tpu.memory_space<vmem>>) attributes {dimension_semantics = [#tpu.dimension_semantics<arbitrary>], iteration_bounds = array<i64: 1>, scalar_prefetch = 0 : i64, scratch_operands = 0 : i64, tpu.core_type = #tpu.core_type<tc>, window_params = [{pipeline_mode = #tpu.pipeline_mode<synchronous>, transform_indices = @transform_0, window_bounds = array<i64: 32, 32>}, {pipeline_mode = #tpu.pipeline_mode<synchronous>, transform_indices = @transform_1, window_bounds = array<i64: 32, 192>}, {pipeline_mode = #tpu.pipeline_mode<synchronous>, transform_indices = @transform_2, window_bounds = array<i64: 32, 128>}, {pipeline_mode = #tpu.pipeline_mode<synchronous>, transform_indices = @transform_3, window_bounds = array<i64: 128, 32>}, {pipeline_mode = #tpu.pipeline_mode<synchronous>, transform_indices = @transform_4, window_bounds = array<i64: 8, 192>}, {pipeline_mode = #tpu.pipeline_mode<synchronous>, transform_indices = @transform_5, window_bounds = array<i64: 32, 32>}, {pipeline_mode = #tpu.pipeline_mode<synchronous>, transform_indices = @transform_6, window_bounds = array<i64: 16, 128>}]} {
    %c0 = arith.constant 0 : index
    %c0_0 = arith.constant 0 : index
    %0 = vector.load %arg1[%c0, %c0_0] : memref<32x32xf32, #tpu.memory_space<vmem>>, vector<32x32xf32>
    %c0_1 = arith.constant 0 : index
    %c0_2 = arith.constant 0 : index
    %1 = vector.load %arg5[%c0_1, %c0_2] : memref<8x192xf32, #tpu.memory_space<vmem>>, vector<8x192xf32>
    %2 = vector.extract_strided_slice %1 {offsets = [0, 0], sizes = [1, 192], strides = [1, 1]} : vector<8x192xf32> to vector<1x192xf32>
    %3 = vector.extract_strided_slice %1 {offsets = [1, 0], sizes = [1, 128], strides = [1, 1]} : vector<8x192xf32> to vector<1x128xf32>
    %4 = vector.extract_strided_slice %1 {offsets = [2, 0], sizes = [1, 32], strides = [1, 1]} : vector<8x192xf32> to vector<1x32xf32>
    %5 = vector.extract_strided_slice %1 {offsets = [3, 0], sizes = [1, 32], strides = [1, 1]} : vector<8x192xf32> to vector<1x32xf32>
    %6 = vector.extract_strided_slice %1 {offsets = [4, 0], sizes = [1, 32], strides = [1, 1]} : vector<8x192xf32> to vector<1x32xf32>
    %7 = vector.extract_strided_slice %1 {offsets = [5, 0], sizes = [1, 32], strides = [1, 1]} : vector<8x192xf32> to vector<1x32xf32>
    %8 = vector.extract_strided_slice %1 {offsets = [6, 0], sizes = [1, 32], strides = [1, 1]} : vector<8x192xf32> to vector<1x32xf32>
    %9 = vector.extract_strided_slice %1 {offsets = [7, 0], sizes = [1, 32], strides = [1, 1]} : vector<8x192xf32> to vector<1x32xf32>
    %c0_3 = arith.constant 0 : index
    %c0_4 = arith.constant 0 : index
    %10 = vector.load %arg2[%c0_3, %c0_4] : memref<32x192xf32, #tpu.memory_space<vmem>>, vector<32x192xf32>
    %cst = arith.constant dense<0.000000e+00> : vector<32x192xf32>
    %11 = tpu.matmul %0, %10, %cst {dimension_numbers = #tpu.dot_dimension_numbers<[1], [0], [0], [1], [0, 0, 1, 1], [], []>} : vector<32x32xf32>, vector<32x192xf32>, vector<32x192xf32> -> vector<32x192xf32>
    %12 = vector.broadcast %2 : vector<1x192xf32> to vector<32x192xf32>
    %13 = arith.addf %11, %12 : vector<32x192xf32>
    %14 = vector.extract_strided_slice %13 {offsets = [0, 0], sizes = [16, 128], strides = [1, 1]} : vector<32x192xf32> to vector<16x128xf32>
    %15 = vector.extract_strided_slice %13 {offsets = [0, 128], sizes = [16, 32], strides = [1, 1]} : vector<32x192xf32> to vector<16x32xf32>
    %16 = vector.extract_strided_slice %13 {offsets = [0, 160], sizes = [16, 32], strides = [1, 1]} : vector<32x192xf32> to vector<16x32xf32>
    %17 = tpu.transpose %16, [1, 0] : vector<16x32xf32> -> vector<32x16xf32>
    %18 = vector.extract_strided_slice %15 {offsets = [0, 0], sizes = [16, 8], strides = [1, 1]} : vector<16x32xf32> to vector<16x8xf32>
    %19 = vector.extract_strided_slice %17 {offsets = [0, 0], sizes = [8, 16], strides = [1, 1]} : vector<32x16xf32> to vector<8x16xf32>
    %cst_5 = arith.constant dense<0.000000e+00> : vector<16x16xf32>
    %20 = tpu.matmul %18, %19, %cst_5 {dimension_numbers = #tpu.dot_dimension_numbers<[1], [0], [0], [1], [0, 0, 1, 1], [], []>} : vector<16x8xf32>, vector<8x16xf32>, vector<16x16xf32> -> vector<16x16xf32>
    %cst_6 = arith.constant dense<0xFF800000> : vector<16xf32>
    %21 = vector.multi_reduction <maximumf>, %20, %cst_6 [1] : vector<16x16xf32> to vector<16xf32>
    %22 = vector.shape_cast %21 : vector<16xf32> to vector<16x1xf32>
    %23 = vector.broadcast %22 : vector<16x1xf32> to vector<16x16xf32>
    %24 = arith.subf %20, %23 : vector<16x16xf32>
    %25 = math.exp %24 : vector<16x16xf32>
    %cst_7 = arith.constant dense<0.000000e+00> : vector<16xf32>
    %26 = vector.multi_reduction <add>, %25, %cst_7 [1] : vector<16x16xf32> to vector<16xf32>
    %27 = vector.shape_cast %26 : vector<16xf32> to vector<16x1xf32>
    %28 = vector.broadcast %27 : vector<16x1xf32> to vector<16x16xf32>
    %29 = arith.divf %25, %28 : vector<16x16xf32>
    %30 = vector.extract_strided_slice %14 {offsets = [0, 0], sizes = [16, 32], strides = [1, 1]} : vector<16x128xf32> to vector<16x32xf32>
    %cst_8 = arith.constant dense<0.000000e+00> : vector<16x32xf32>
    %31 = tpu.matmul %29, %30, %cst_8 {dimension_numbers = #tpu.dot_dimension_numbers<[1], [0], [0], [1], [0, 0, 1, 1], [], []>} : vector<16x16xf32>, vector<16x32xf32>, vector<16x32xf32> -> vector<16x32xf32>
    %32 = vector.extract_strided_slice %15 {offsets = [0, 8], sizes = [16, 8], strides = [1, 1]} : vector<16x32xf32> to vector<16x8xf32>
    %33 = vector.extract_strided_slice %17 {offsets = [8, 0], sizes = [8, 16], strides = [1, 1]} : vector<32x16xf32> to vector<8x16xf32>
    %cst_9 = arith.constant dense<0.000000e+00> : vector<16x16xf32>
    %34 = tpu.matmul %32, %33, %cst_9 {dimension_numbers = #tpu.dot_dimension_numbers<[1], [0], [0], [1], [0, 0, 1, 1], [], []>} : vector<16x8xf32>, vector<8x16xf32>, vector<16x16xf32> -> vector<16x16xf32>
    %cst_10 = arith.constant dense<0xFF800000> : vector<16xf32>
    %35 = vector.multi_reduction <maximumf>, %34, %cst_10 [1] : vector<16x16xf32> to vector<16xf32>
    %36 = vector.shape_cast %35 : vector<16xf32> to vector<16x1xf32>
    %37 = vector.broadcast %36 : vector<16x1xf32> to vector<16x16xf32>
    %38 = arith.subf %34, %37 : vector<16x16xf32>
    %39 = math.exp %38 : vector<16x16xf32>
    %cst_11 = arith.constant dense<0.000000e+00> : vector<16xf32>
    %40 = vector.multi_reduction <add>, %39, %cst_11 [1] : vector<16x16xf32> to vector<16xf32>
    %41 = vector.shape_cast %40 : vector<16xf32> to vector<16x1xf32>
    %42 = vector.broadcast %41 : vector<16x1xf32> to vector<16x16xf32>
    %43 = arith.divf %39, %42 : vector<16x16xf32>
    %44 = vector.extract_strided_slice %14 {offsets = [0, 32], sizes = [16, 32], strides = [1, 1]} : vector<16x128xf32> to vector<16x32xf32>
    %cst_12 = arith.constant dense<0.000000e+00> : vector<16x32xf32>
    %45 = tpu.matmul %43, %44, %cst_12 {dimension_numbers = #tpu.dot_dimension_numbers<[1], [0], [0], [1], [0, 0, 1, 1], [], []>} : vector<16x16xf32>, vector<16x32xf32>, vector<16x32xf32> -> vector<16x32xf32>
    %46 = arith.addf %31, %45 : vector<16x32xf32>
    %47 = vector.extract_strided_slice %15 {offsets = [0, 16], sizes = [16, 8], strides = [1, 1]} : vector<16x32xf32> to vector<16x8xf32>
    %48 = vector.extract_strided_slice %17 {offsets = [16, 0], sizes = [8, 16], strides = [1, 1]} : vector<32x16xf32> to vector<8x16xf32>
    %cst_13 = arith.constant dense<0.000000e+00> : vector<16x16xf32>
    %49 = tpu.matmul %47, %48, %cst_13 {dimension_numbers = #tpu.dot_dimension_numbers<[1], [0], [0], [1], [0, 0, 1, 1], [], []>} : vector<16x8xf32>, vector<8x16xf32>, vector<16x16xf32> -> vector<16x16xf32>
    %cst_14 = arith.constant dense<0xFF800000> : vector<16xf32>
    %50 = vector.multi_reduction <maximumf>, %49, %cst_14 [1] : vector<16x16xf32> to vector<16xf32>
    %51 = vector.shape_cast %50 : vector<16xf32> to vector<16x1xf32>
    %52 = vector.broadcast %51 : vector<16x1xf32> to vector<16x16xf32>
    %53 = arith.subf %49, %52 : vector<16x16xf32>
    %54 = math.exp %53 : vector<16x16xf32>
    %cst_15 = arith.constant dense<0.000000e+00> : vector<16xf32>
    %55 = vector.multi_reduction <add>, %54, %cst_15 [1] : vector<16x16xf32> to vector<16xf32>
    %56 = vector.shape_cast %55 : vector<16xf32> to vector<16x1xf32>
    %57 = vector.broadcast %56 : vector<16x1xf32> to vector<16x16xf32>
    %58 = arith.divf %54, %57 : vector<16x16xf32>
    %59 = vector.extract_strided_slice %14 {offsets = [0, 64], sizes = [16, 32], strides = [1, 1]} : vector<16x128xf32> to vector<16x32xf32>
    %cst_16 = arith.constant dense<0.000000e+00> : vector<16x32xf32>
    %60 = tpu.matmul %58, %59, %cst_16 {dimension_numbers = #tpu.dot_dimension_numbers<[1], [0], [0], [1], [0, 0, 1, 1], [], []>} : vector<16x16xf32>, vector<16x32xf32>, vector<16x32xf32> -> vector<16x32xf32>
    %61 = arith.addf %46, %60 : vector<16x32xf32>
    %62 = vector.extract_strided_slice %15 {offsets = [0, 24], sizes = [16, 8], strides = [1, 1]} : vector<16x32xf32> to vector<16x8xf32>
    %63 = vector.extract_strided_slice %17 {offsets = [24, 0], sizes = [8, 16], strides = [1, 1]} : vector<32x16xf32> to vector<8x16xf32>
    %cst_17 = arith.constant dense<0.000000e+00> : vector<16x16xf32>
    %64 = tpu.matmul %62, %63, %cst_17 {dimension_numbers = #tpu.dot_dimension_numbers<[1], [0], [0], [1], [0, 0, 1, 1], [], []>} : vector<16x8xf32>, vector<8x16xf32>, vector<16x16xf32> -> vector<16x16xf32>
    %cst_18 = arith.constant dense<0xFF800000> : vector<16xf32>
    %65 = vector.multi_reduction <maximumf>, %64, %cst_18 [1] : vector<16x16xf32> to vector<16xf32>
    %66 = vector.shape_cast %65 : vector<16xf32> to vector<16x1xf32>
    %67 = vector.broadcast %66 : vector<16x1xf32> to vector<16x16xf32>
    %68 = arith.subf %64, %67 : vector<16x16xf32>
    %69 = math.exp %68 : vector<16x16xf32>
    %cst_19 = arith.constant dense<0.000000e+00> : vector<16xf32>
    %70 = vector.multi_reduction <add>, %69, %cst_19 [1] : vector<16x16xf32> to vector<16xf32>
    %71 = vector.shape_cast %70 : vector<16xf32> to vector<16x1xf32>
    %72 = vector.broadcast %71 : vector<16x1xf32> to vector<16x16xf32>
    %73 = arith.divf %69, %72 : vector<16x16xf32>
    %74 = vector.extract_strided_slice %14 {offsets = [0, 96], sizes = [16, 32], strides = [1, 1]} : vector<16x128xf32> to vector<16x32xf32>
    %cst_20 = arith.constant dense<0.000000e+00> : vector<16x32xf32>
    %75 = tpu.matmul %73, %74, %cst_20 {dimension_numbers = #tpu.dot_dimension_numbers<[1], [0], [0], [1], [0, 0, 1, 1], [], []>} : vector<16x16xf32>, vector<16x32xf32>, vector<16x32xf32> -> vector<16x32xf32>
    %76 = arith.addf %61, %75 : vector<16x32xf32>
    %77 = vector.extract_strided_slice %13 {offsets = [16, 0], sizes = [16, 128], strides = [1, 1]} : vector<32x192xf32> to vector<16x128xf32>
    %78 = vector.extract_strided_slice %13 {offsets = [16, 128], sizes = [16, 32], strides = [1, 1]} : vector<32x192xf32> to vector<16x32xf32>
    %79 = vector.extract_strided_slice %13 {offsets = [16, 160], sizes = [16, 32], strides = [1, 1]} : vector<32x192xf32> to vector<16x32xf32>
    %80 = tpu.transpose %79, [1, 0] : vector<16x32xf32> -> vector<32x16xf32>
    %81 = vector.extract_strided_slice %78 {offsets = [0, 0], sizes = [16, 8], strides = [1, 1]} : vector<16x32xf32> to vector<16x8xf32>
    %82 = vector.extract_strided_slice %80 {offsets = [0, 0], sizes = [8, 16], strides = [1, 1]} : vector<32x16xf32> to vector<8x16xf32>
    %cst_21 = arith.constant dense<0.000000e+00> : vector<16x16xf32>
    %83 = tpu.matmul %81, %82, %cst_21 {dimension_numbers = #tpu.dot_dimension_numbers<[1], [0], [0], [1], [0, 0, 1, 1], [], []>} : vector<16x8xf32>, vector<8x16xf32>, vector<16x16xf32> -> vector<16x16xf32>
    %cst_22 = arith.constant dense<0xFF800000> : vector<16xf32>
    %84 = vector.multi_reduction <maximumf>, %83, %cst_22 [1] : vector<16x16xf32> to vector<16xf32>
    %85 = vector.shape_cast %84 : vector<16xf32> to vector<16x1xf32>
    %86 = vector.broadcast %85 : vector<16x1xf32> to vector<16x16xf32>
    %87 = arith.subf %83, %86 : vector<16x16xf32>
    %88 = math.exp %87 : vector<16x16xf32>
    %cst_23 = arith.constant dense<0.000000e+00> : vector<16xf32>
    %89 = vector.multi_reduction <add>, %88, %cst_23 [1] : vector<16x16xf32> to vector<16xf32>
    %90 = vector.shape_cast %89 : vector<16xf32> to vector<16x1xf32>
    %91 = vector.broadcast %90 : vector<16x1xf32> to vector<16x16xf32>
    %92 = arith.divf %88, %91 : vector<16x16xf32>
    %93 = vector.extract_strided_slice %77 {offsets = [0, 0], sizes = [16, 32], strides = [1, 1]} : vector<16x128xf32> to vector<16x32xf32>
    %cst_24 = arith.constant dense<0.000000e+00> : vector<16x32xf32>
    %94 = tpu.matmul %92, %93, %cst_24 {dimension_numbers = #tpu.dot_dimension_numbers<[1], [0], [0], [1], [0, 0, 1, 1], [], []>} : vector<16x16xf32>, vector<16x32xf32>, vector<16x32xf32> -> vector<16x32xf32>
    %95 = vector.extract_strided_slice %78 {offsets = [0, 8], sizes = [16, 8], strides = [1, 1]} : vector<16x32xf32> to vector<16x8xf32>
    %96 = vector.extract_strided_slice %80 {offsets = [8, 0], sizes = [8, 16], strides = [1, 1]} : vector<32x16xf32> to vector<8x16xf32>
    %cst_25 = arith.constant dense<0.000000e+00> : vector<16x16xf32>
    %97 = tpu.matmul %95, %96, %cst_25 {dimension_numbers = #tpu.dot_dimension_numbers<[1], [0], [0], [1], [0, 0, 1, 1], [], []>} : vector<16x8xf32>, vector<8x16xf32>, vector<16x16xf32> -> vector<16x16xf32>
    %cst_26 = arith.constant dense<0xFF800000> : vector<16xf32>
    %98 = vector.multi_reduction <maximumf>, %97, %cst_26 [1] : vector<16x16xf32> to vector<16xf32>
    %99 = vector.shape_cast %98 : vector<16xf32> to vector<16x1xf32>
    %100 = vector.broadcast %99 : vector<16x1xf32> to vector<16x16xf32>
    %101 = arith.subf %97, %100 : vector<16x16xf32>
    %102 = math.exp %101 : vector<16x16xf32>
    %cst_27 = arith.constant dense<0.000000e+00> : vector<16xf32>
    %103 = vector.multi_reduction <add>, %102, %cst_27 [1] : vector<16x16xf32> to vector<16xf32>
    %104 = vector.shape_cast %103 : vector<16xf32> to vector<16x1xf32>
    %105 = vector.broadcast %104 : vector<16x1xf32> to vector<16x16xf32>
    %106 = arith.divf %102, %105 : vector<16x16xf32>
    %107 = vector.extract_strided_slice %77 {offsets = [0, 32], sizes = [16, 32], strides = [1, 1]} : vector<16x128xf32> to vector<16x32xf32>
    %cst_28 = arith.constant dense<0.000000e+00> : vector<16x32xf32>
    %108 = tpu.matmul %106, %107, %cst_28 {dimension_numbers = #tpu.dot_dimension_numbers<[1], [0], [0], [1], [0, 0, 1, 1], [], []>} : vector<16x16xf32>, vector<16x32xf32>, vector<16x32xf32> -> vector<16x32xf32>
    %109 = arith.addf %94, %108 : vector<16x32xf32>
    %110 = vector.extract_strided_slice %78 {offsets = [0, 16], sizes = [16, 8], strides = [1, 1]} : vector<16x32xf32> to vector<16x8xf32>
    %111 = vector.extract_strided_slice %80 {offsets = [16, 0], sizes = [8, 16], strides = [1, 1]} : vector<32x16xf32> to vector<8x16xf32>
    %cst_29 = arith.constant dense<0.000000e+00> : vector<16x16xf32>
    %112 = tpu.matmul %110, %111, %cst_29 {dimension_numbers = #tpu.dot_dimension_numbers<[1], [0], [0], [1], [0, 0, 1, 1], [], []>} : vector<16x8xf32>, vector<8x16xf32>, vector<16x16xf32> -> vector<16x16xf32>
    %cst_30 = arith.constant dense<0xFF800000> : vector<16xf32>
    %113 = vector.multi_reduction <maximumf>, %112, %cst_30 [1] : vector<16x16xf32> to vector<16xf32>
    %114 = vector.shape_cast %113 : vector<16xf32> to vector<16x1xf32>
    %115 = vector.broadcast %114 : vector<16x1xf32> to vector<16x16xf32>
    %116 = arith.subf %112, %115 : vector<16x16xf32>
    %117 = math.exp %116 : vector<16x16xf32>
    %cst_31 = arith.constant dense<0.000000e+00> : vector<16xf32>
    %118 = vector.multi_reduction <add>, %117, %cst_31 [1] : vector<16x16xf32> to vector<16xf32>
    %119 = vector.shape_cast %118 : vector<16xf32> to vector<16x1xf32>
    %120 = vector.broadcast %119 : vector<16x1xf32> to vector<16x16xf32>
    %121 = arith.divf %117, %120 : vector<16x16xf32>
    %122 = vector.extract_strided_slice %77 {offsets = [0, 64], sizes = [16, 32], strides = [1, 1]} : vector<16x128xf32> to vector<16x32xf32>
    %cst_32 = arith.constant dense<0.000000e+00> : vector<16x32xf32>
    %123 = tpu.matmul %121, %122, %cst_32 {dimension_numbers = #tpu.dot_dimension_numbers<[1], [0], [0], [1], [0, 0, 1, 1], [], []>} : vector<16x16xf32>, vector<16x32xf32>, vector<16x32xf32> -> vector<16x32xf32>
    %124 = arith.addf %109, %123 : vector<16x32xf32>
    %125 = vector.extract_strided_slice %78 {offsets = [0, 24], sizes = [16, 8], strides = [1, 1]} : vector<16x32xf32> to vector<16x8xf32>
    %126 = vector.extract_strided_slice %80 {offsets = [24, 0], sizes = [8, 16], strides = [1, 1]} : vector<32x16xf32> to vector<8x16xf32>
    %cst_33 = arith.constant dense<0.000000e+00> : vector<16x16xf32>
    %127 = tpu.matmul %125, %126, %cst_33 {dimension_numbers = #tpu.dot_dimension_numbers<[1], [0], [0], [1], [0, 0, 1, 1], [], []>} : vector<16x8xf32>, vector<8x16xf32>, vector<16x16xf32> -> vector<16x16xf32>
    %cst_34 = arith.constant dense<0xFF800000> : vector<16xf32>
    %128 = vector.multi_reduction <maximumf>, %127, %cst_34 [1] : vector<16x16xf32> to vector<16xf32>
    %129 = vector.shape_cast %128 : vector<16xf32> to vector<16x1xf32>
    %130 = vector.broadcast %129 : vector<16x1xf32> to vector<16x16xf32>
    %131 = arith.subf %127, %130 : vector<16x16xf32>
    %132 = math.exp %131 : vector<16x16xf32>
    %cst_35 = arith.constant dense<0.000000e+00> : vector<16xf32>
    %133 = vector.multi_reduction <add>, %132, %cst_35 [1] : vector<16x16xf32> to vector<16xf32>
    %134 = vector.shape_cast %133 : vector<16xf32> to vector<16x1xf32>
    %135 = vector.broadcast %134 : vector<16x1xf32> to vector<16x16xf32>
    %136 = arith.divf %132, %135 : vector<16x16xf32>
    %137 = vector.extract_strided_slice %77 {offsets = [0, 96], sizes = [16, 32], strides = [1, 1]} : vector<16x128xf32> to vector<16x32xf32>
    %cst_36 = arith.constant dense<0.000000e+00> : vector<16x32xf32>
    %138 = tpu.matmul %136, %137, %cst_36 {dimension_numbers = #tpu.dot_dimension_numbers<[1], [0], [0], [1], [0, 0, 1, 1], [], []>} : vector<16x16xf32>, vector<16x32xf32>, vector<16x32xf32> -> vector<16x32xf32>
    %139 = arith.addf %124, %138 : vector<16x32xf32>
    %140 = tpu.concatenate %76, %139 in 0 : vector<16x32xf32>, vector<16x32xf32> -> vector<32x32xf32>
    %141 = vector.broadcast %4 : vector<1x32xf32> to vector<32x32xf32>
    %142 = arith.addf %140, %141 : vector<32x32xf32>
    %143 = arith.addf %0, %142 : vector<32x32xf32>
    %cst_37 = arith.constant dense<0.000000e+00> : vector<32xf32>
    %144 = vector.multi_reduction <add>, %143, %cst_37 [1] : vector<32x32xf32> to vector<32xf32>
    %145 = vector.shape_cast %144 : vector<32xf32> to vector<32x1xf32>
    %cst_38 = arith.constant 3.200000e+01 : f32
    %146 = vector.broadcast %cst_38 : f32 to vector<32x1xf32>
    %147 = arith.divf %145, %146 : vector<32x1xf32>
    %148 = vector.broadcast %147 : vector<32x1xf32> to vector<32x32xf32>
    %149 = arith.subf %143, %148 : vector<32x32xf32>
    %150 = vector.broadcast %147 : vector<32x1xf32> to vector<32x32xf32>
    %151 = arith.subf %143, %150 : vector<32x32xf32>
    %152 = arith.mulf %149, %151 : vector<32x32xf32>
    %cst_39 = arith.constant dense<0.000000e+00> : vector<32xf32>
    %153 = vector.multi_reduction <add>, %152, %cst_39 [1] : vector<32x32xf32> to vector<32xf32>
    %154 = vector.shape_cast %153 : vector<32xf32> to vector<32x1xf32>
    %cst_40 = arith.constant 3.200000e+01 : f32
    %155 = vector.broadcast %cst_40 : f32 to vector<32x1xf32>
    %156 = arith.divf %154, %155 : vector<32x1xf32>
    %157 = vector.broadcast %147 : vector<32x1xf32> to vector<32x32xf32>
    %158 = arith.subf %143, %157 : vector<32x32xf32>
    %cst_41 = arith.constant 9.99999974E-6 : f32
    %159 = vector.broadcast %cst_41 : f32 to vector<32x1xf32>
    %160 = arith.addf %156, %159 : vector<32x1xf32>
    %161 = math.rsqrt %160 : vector<32x1xf32>
    %162 = vector.broadcast %161 : vector<32x1xf32> to vector<32x32xf32>
    %163 = arith.mulf %158, %162 : vector<32x32xf32>
    %164 = vector.broadcast %5 : vector<1x32xf32> to vector<32x32xf32>
    %165 = arith.mulf %163, %164 : vector<32x32xf32>
    %166 = vector.broadcast %6 : vector<1x32xf32> to vector<32x32xf32>
    %167 = arith.addf %165, %166 : vector<32x32xf32>
    %c0_42 = arith.constant 0 : index
    %c0_43 = arith.constant 0 : index
    %168 = vector.load %arg3[%c0_42, %c0_43] : memref<32x128xf32, #tpu.memory_space<vmem>>, vector<32x128xf32>
    %cst_44 = arith.constant dense<0.000000e+00> : vector<32x128xf32>
    %169 = tpu.matmul %167, %168, %cst_44 {dimension_numbers = #tpu.dot_dimension_numbers<[1], [0], [0], [1], [0, 0, 1, 1], [], []>} : vector<32x32xf32>, vector<32x128xf32>, vector<32x128xf32> -> vector<32x128xf32>
    %170 = vector.broadcast %3 : vector<1x128xf32> to vector<32x128xf32>
    %171 = arith.addf %169, %170 : vector<32x128xf32>
    %cst_45 = arith.constant 0.000000e+00 : f32
    %172 = vector.broadcast %cst_45 : f32 to vector<32x128xf32>
    %173 = arith.maximumf %171, %172 : vector<32x128xf32>
    %c0_46 = arith.constant 0 : index
    %c0_47 = arith.constant 0 : index
    %174 = vector.load %arg4[%c0_46, %c0_47] : memref<128x32xf32, #tpu.memory_space<vmem>>, vector<128x32xf32>
    %cst_48 = arith.constant dense<0.000000e+00> : vector<32x32xf32>
    %175 = tpu.matmul %173, %174, %cst_48 {dimension_numbers = #tpu.dot_dimension_numbers<[1], [0], [0], [1], [0, 0, 1, 1], [], []>} : vector<32x128xf32>, vector<128x32xf32>, vector<32x32xf32> -> vector<32x32xf32>
    %176 = vector.broadcast %7 : vector<1x32xf32> to vector<32x32xf32>
    %177 = arith.addf %175, %176 : vector<32x32xf32>
    %178 = arith.addf %167, %177 : vector<32x32xf32>
    %cst_49 = arith.constant dense<0.000000e+00> : vector<32xf32>
    %179 = vector.multi_reduction <add>, %178, %cst_49 [1] : vector<32x32xf32> to vector<32xf32>
    %180 = vector.shape_cast %179 : vector<32xf32> to vector<32x1xf32>
    %cst_50 = arith.constant 3.200000e+01 : f32
    %181 = vector.broadcast %cst_50 : f32 to vector<32x1xf32>
    %182 = arith.divf %180, %181 : vector<32x1xf32>
    %183 = vector.broadcast %182 : vector<32x1xf32> to vector<32x32xf32>
    %184 = arith.subf %178, %183 : vector<32x32xf32>
    %185 = vector.broadcast %182 : vector<32x1xf32> to vector<32x32xf32>
    %186 = arith.subf %178, %185 : vector<32x32xf32>
    %187 = arith.mulf %184, %186 : vector<32x32xf32>
    %cst_51 = arith.constant dense<0.000000e+00> : vector<32xf32>
    %188 = vector.multi_reduction <add>, %187, %cst_51 [1] : vector<32x32xf32> to vector<32xf32>
    %189 = vector.shape_cast %188 : vector<32xf32> to vector<32x1xf32>
    %cst_52 = arith.constant 3.200000e+01 : f32
    %190 = vector.broadcast %cst_52 : f32 to vector<32x1xf32>
    %191 = arith.divf %189, %190 : vector<32x1xf32>
    %192 = vector.broadcast %182 : vector<32x1xf32> to vector<32x32xf32>
    %193 = arith.subf %178, %192 : vector<32x32xf32>
    %cst_53 = arith.constant 9.99999974E-6 : f32
    %194 = vector.broadcast %cst_53 : f32 to vector<32x1xf32>
    %195 = arith.addf %191, %194 : vector<32x1xf32>
    %196 = math.rsqrt %195 : vector<32x1xf32>
    %197 = vector.broadcast %196 : vector<32x1xf32> to vector<32x32xf32>
    %198 = arith.mulf %193, %197 : vector<32x32xf32>
    %199 = vector.broadcast %8 : vector<1x32xf32> to vector<32x32xf32>
    %200 = arith.mulf %198, %199 : vector<32x32xf32>
    %201 = vector.broadcast %9 : vector<1x32xf32> to vector<32x32xf32>
    %202 = arith.addf %200, %201 : vector<32x32xf32>
    %c0_54 = arith.constant 0 : index
    %c0_55 = arith.constant 0 : index
    %203 = vector.load %arg6[%c0_54, %c0_55] : memref<32x32xf32, #tpu.memory_space<vmem>>, vector<32x32xf32>
    tpu.vector_store %arg6[%c0_54, %c0_55], %202 {strides = array<i32>} : memref<32x32xf32, #tpu.memory_space<vmem>>, vector<32x32xf32>,
    %204 = tpu.concatenate %29, %43, %58, %73, %92, %106, %121, %136 in 1 : vector<16x16xf32>, vector<16x16xf32>, vector<16x16xf32>, vector<16x16xf32>, vector<16x16xf32>, vector<16x16xf32>, vector<16x16xf32>, vector<16x16xf32> -> vector<16x128xf32>
    %c0_56 = arith.constant 0 : index
    %c0_57 = arith.constant 0 : index
    %205 = vector.load %arg7[%c0_56, %c0_57] : memref<16x128xf32, #tpu.memory_space<vmem>>, vector<16x128xf32>
    tpu.vector_store %arg7[%c0_56, %c0_57], %204 {strides = array<i32>} : memref<16x128xf32, #tpu.memory_space<vmem>>, vector<16x128xf32>,
    return
  }
  func.func @transform_0(%arg0: i32) -> (i32, i32) {
    %c0_i32 = arith.constant 0 : i32
    %c0_i32_0 = arith.constant 0 : i32
    %c0_i32_1 = arith.constant 0 : i32
    return %c0_i32, %c0_i32_0 : i32, i32
  }
  func.func @transform_1(%arg0: i32) -> (i32, i32) {
    %c0_i32 = arith.constant 0 : i32
    %c0_i32_0 = arith.constant 0 : i32
    %c0_i32_1 = arith.constant 0 : i32
    return %c0_i32, %c0_i32_0 : i32, i32
  }
  func.func @transform_2(%arg0: i32) -> (i32, i32) {
    %c0_i32 = arith.constant 0 : i32
    %c0_i32_0 = arith.constant 0 : i32
    %c0_i32_1 = arith.constant 0 : i32
    return %c0_i32, %c0_i32_0 : i32, i32
  }
  func.func @transform_3(%arg0: i32) -> (i32, i32) {
    %c0_i32 = arith.constant 0 : i32
    %c0_i32_0 = arith.constant 0 : i32
    %c0_i32_1 = arith.constant 0 : i32
    return %c0_i32, %c0_i32_0 : i32, i32
  }
  func.func @transform_4(%arg0: i32) -> (i32, i32) {
    %c0_i32 = arith.constant 0 : i32
    %c0_i32_0 = arith.constant 0 : i32
    %c0_i32_1 = arith.constant 0 : i32
    return %c0_i32, %c0_i32_0 : i32, i32
  }
  func.func @transform_5(%arg0: i32) -> (i32, i32) {
    %c0_i32 = arith.constant 0 : i32
    %c0_i32_0 = arith.constant 0 : i32
    %c0_i32_1 = arith.constant 0 : i32
    return %c0_i32, %c0_i32_0 : i32, i32
  }
  func.func @transform_6(%arg0: i32) -> (i32, i32) {
    %c0_i32 = arith.constant 0 : i32
    %c0_i32_0 = arith.constant 0 : i32
    %c0_i32_1 = arith.constant 0 : i32
    return %c0_i32, %c0_i32_0 : i32, i32
  }
}

</mosaic_0001>

<bundles_post_ra>
// kernel: tpu_custom_call.1
= control target key start
LH: loop header
LB: loop body
LE: loop exit
PB: predicated region body
PF: predicated region fallthrough
CT: control target
= control target key end

     0   :  { %12 = vsyncpa [#allocation3], 0  ;;  %v2879_v7 = vmov 0.0   ;;  %s3506_s0 = inlined_call_operand.vmem [shape: f32[32,32], index: 0, kind: input, shape index: {}]   ;;  %s3507_s1 = inlined_call_operand.vmem [shape: f32[32,192], index: 1, kind: input, shape index: {}]   ;;  %s3508_s2 = inlined_call_operand.vmem [shape: f32[32,128], index: 2, kind: input, shape index: {}]   ;;  %s3509_s3 = inlined_call_operand.vmem [shape: f32[128,32], index: 3, kind: input, shape index: {}]   ;;  %s3510_s4 = inlined_call_operand.vmem [shape: f32[8,192], index: 4, kind: input, shape index: {}]   ;;  %s3511_s5 = inlined_call_operand.hbm [shape: f32[32,32], index: 5, kind: output, shape index: {0}]   ;;  %s3512_s6 = inlined_call_operand.hbm [shape: f32[16,128], index: 6, kind: output, shape index: {1}]  }
   0x1   :  { %v31_v0 = vld [vmem:[%s3507_s1 + $0x8] sm:$0xff]  ;;  %v33_v1 = vld [vmem:[%s3507_s1 + $0x18] sm:$0xff]  ;;  %v30_v2 = vld [vmem:[%s3507_s1] sm:$0xff]  ;;  %123 = vmatprep.mubr.f32.mxu0 %v2879_v7 }
   0x2   :  { %v2524_v3 = vpack.c.bf16 %v33_v1, %v31_v0  ;;  %v32_v4 = vld [vmem:[%s3507_s1 + $0x10] sm:$0xff]  ;;  %v35_v5 = vld [vmem:[%s3507_s1 + $0x28] sm:$0xff]  ;;  %v37_v6 = vld [vmem:[%s3507_s1 + $0x38] sm:$0xff] }
   0x3   :  { %v2526_v8 = vpack.c.bf16 %v32_v4, %v30_v2  ;;  %v2528_v9 = vpack.c.bf16 %v37_v6, %v35_v5  ;;  %v34_v10 = vld [vmem:[%s3507_s1 + $0x20] sm:$0xff]  ;;  %v36_v11 = vld [vmem:[%s3507_s1 + $0x30] sm:$0xff] }
   0x4   :  { %2525 = vmatprep.subr.bf16.mxu0 %v2524_v3  ;;  %v2530_v12 = vpack.c.bf16 %v36_v11, %v34_v10 }
   0x5   :  { %2527 = vmatpush1.bf16.msra.mxu0 %v2526_v8 }
   0x6   :  { %13 = vsyncpa [#allocation5], 0  ;;  %2529 = vmatprep.subr.bf16.mxu0 %v2528_v9  ;;  %v2957_v13 = vld [vmem:[%s3506_s0] sm:$0xff]  ;;  %vm46_vm0 = vcmask 261120   ;;  %v2964_v14 = vld [vmem:[%s3506_s0 + $0x8] sm:$0xff]  ;;  %v38_v17 = vlaneseq  ;;  %vm154_vm1 = vcmask 64512  }
   0x7   :  { %v2971_v15 = vld [vmem:[%s3506_s0 + $0x10] sm:$0xff]  ;;  %v2978_v16 = vld [vmem:[%s3506_s0 + $0x18] sm:$0xff]  ;;  %v29_v20 = vld [vmem:[%s3510_s4 + $0x8] sm:$0xff]  ;;  %s2880_s0 = smov 120   ;;  %s2881_s24 = smov 88   ;;  %vm238_vm3 = vcmask 130048  }
   0x8   :  { %v2982_v18 = vshrl.u32 %v38_v17, 7  ;;  %v2991_v21 = vld [vmem:[%s3510_s4] sm:$0xff]  ;;  %vm3019_vm2 = vmpackc.low %vm154_vm1, %vm154_vm1  ;;  %s2882_s25 = smov 96   ;;  %s2883_s26 = smov 80   ;;  %vm2163_vm4 = vcmask 392192   ;;  %vm2166_vm5 = vcmask 523264  }
   0x9   :  { %2531 = vmatpush1.bf16.msra.mxu0 %v2530_v12  ;;  %s2884_s27 = smov 72   ;;  %s2885_s28 = smov 104   ;;  %vm2169_vm6 = vcmask 654336   ;;  %vm2175_vm7 = vcmask 916480   ;;  %vm2172_vm8 = vcmask 785408  }
   0xa   :  { %v40_v19 = vsub.s32 0, %v2982_v18  ;;  %s2886_s29 = smov 112   ;;  %s2887_s30 = smov 32  }
   0xb   :  { %s2888_s7 = smov 64  }
   0xc   :  { %2212 = vmatmul.mubr.msk.f32.vlgmr.msra.gmra.mrb[0].mxu0 %vm46_vm0, %v2957_v13  ;;  %v2993_v22 = vrot.slane %v29_v20, %v40_v19  ;;  %v2996_v24 = vrot.slane %v2991_v21, %v40_v19 }
   0xd   :  { %129 = vmatprep.mubr.f32.mxu0 %v2879_v7 }
  0x10   :  { %2213 = vmatmul.mubr.msk.f32.gmra.mrb[2].mxu0 %vm46_vm0, %v2964_v14 }
  0x11   :  { %135 = vmatprep.mubr.f32.mxu0 %v2879_v7 }
  0x14   :  { %2214 = vmatmul.mubr.msk.f32.gmra.mrb[4].mxu0 %vm46_vm0, %v2971_v15 }
  0x15   :  { %141 = vmatprep.mubr.f32.mxu0 %v2879_v7 }
  0x18   :  { %2215 = vmatmul.mubr.msk.f32.gmra.mrb[6].mxu0 %vm46_vm0, %v2978_v16 }
  0xdf   :  { %v125_v23 = vpop.f32.mrb[0].mxu0 }
  0xe0   :  { %v127_v25 = vpop.f32.mrb[1].mxu0  ;;  %v126_v28 = vadd.f32 %v125_v23, %v2996_v24 }
  0xe1   :  { %v2999_v26 = vadd.f32 %v127_v25, %v2993_v22 }
  0xe3   :  { %v131_v27 = vpop.f32.mrb[2].mxu0  ;;  %2364 = vmatprep.mubr.msk.f32.mxu0 %vm154_vm1, %v2999_v26 }
  0xe4   :  { %v132_v29 = vadd.f32 %v131_v27, %v2996_v24  ;;  %v133_v30 = vpop.f32.mrb[3].mxu0 }
  0xe5   :  { %v3006_v31 = vadd.f32 %v133_v30, %v2993_v22 }
  0xe6   :  { %v2548_v32 = vpack.c.bf16 %v132_v29, %v126_v28  ;;  %v3008_v33 = vpack.i.bf16 %v132_v29, %v126_v28 }
  0xe7   :  { %263 = vrot.lane.b32.xlu1 %v3006_v31, %s2880_s0  ;;  %v2680_v34 = vpack.i.bf16 %v3006_v31, %v2999_v26  ;;  %v137_v4 = vpop.f32.mrb[4].mxu0 }
  0xe8   :  { %v139_v5 = vpop.f32.mrb[5].mxu0 }
  0xe9   :  { %2681 = vrot.lane.b32.xlu0 %v2680_v34, %s2881_s24  ;;  %v3074_v29 = vadd.f32 %v139_v5, %v2993_v22 }
  0xeb   :  { %v143_v6 = vpop.f32.mrb[6].mxu0 }
  0xec   :  { %v3054_v7 = vpop.f32.mrb[7].mxu0 }
  0xed   :  { %261 = vrot.lane.b32.xlu0 %v2999_v26, %s2880_s0 }
 0x159   :  { %v264_v41 = vpop.permute.xlu1 %263 }
 0x15b   :  { %v2682_v35 = vpop.permute.xlu0 %2681 }
 0x15c   :  { %v2684_v36 = vunpack.i.h.bf16 %v2682_v35  ;;  %v2683_v37 = vunpack.i.l.bf16 %v2682_v35 }
 0x15e   :  { %v2538_v39 = vpack.c.bf16 %v2684_v36, %v2683_v37  ;;  %v138_v36 = vadd.f32 %v137_v4, %v2996_v24  ;;  %v144_v37 = vadd.f32 %v143_v6, %v2996_v24 }
 0x15f   :  { %v262_v40 = vpop.permute.xlu0 %261 }
 0x160   :  { %2540 = vmatprep.subr.msk.bf16.mxu1 %vm3019_vm2, %v2538_v39  ;;  %2371 = vmatprep.mubr.msk.f32.mxu1 %vm154_vm1, %v262_v40  ;;  %v3085_v40 = vpack.c.bf16 %v144_v37, %v138_v36 }
 0x161   :  { %2543 = vmatpush3.bf16.xpose.msk.msra.mxu1 %vm3019_vm2, %v2538_v39  ;;  %v3083_v39 = vpack.i.bf16 %v144_v37, %v138_v36 }
 0x162   :  { %2549 = vmatprep.subr.bf16.mxu1 %v2548_v32 }
 0x168   :  { %2372 = vmatmul.mubr.msk.f32.vlgmr.msra.gmra.mrb[0].mxu1 %vm154_vm1, %v264_v41 }
 0x169   :  { %2551 = vmatpush3.bf16.msra.mxu1 %v2548_v32 }
 0x23b   :  { %v2373_v42 = vpop.f32.mrb[0].mxu1 }
 0x23c   :  { %v343_v43 = vpop.f32.mrb[1].mxu1  ;;  %v355_v44 = vsel %vm238_vm3, %v2373_v42, -inf }
 0x23d   :  { %356 = vmax.xlane.f32.xlu0 %v355_v44  ;;  %v352_v45 = vsel %vm238_vm3, %v343_v43, -inf }
 0x23e   :  { %353 = vmax.xlane.f32.xlu1 %v352_v45 }
 0x24f   :  { %2691 = vrot.lane.b32.xlu1 %v3008_v33, %s2882_s25 }
 0x253   :  { %2686 = vrot.lane.b32.xlu0 %v2680_v34, %s2882_s25  ;;  %2696 = vrot.lane.b32.xlu1 %v2680_v34, %s2883_s26 }
 0x2ca   :  { %v357_v46 = vpop.xlane.xlu0 %356 }
 0x2cb   :  { %v359_v47 = vsub.f32 %v2373_v42, %v357_v46  ;;  %v354_v48 = vpop.xlane.xlu1 %353 }
 0x2cc   :  { %v358_v49 = vsub.f32 %v343_v43, %v354_v48 }
 0x2cd   :  { %v362_v50 = vmul.f32 1.442695, %v359_v47 }
 0x2ce   :  { %v360_v51 = vmul.f32 1.442695, %v358_v49  ;;  %v2687_v52 = vpop.permute.xlu0 %2686 }
 0x2cf   :  { %2750 = vpow2.f32 %v362_v50  ;;  %v2689_v53 = vunpack.i.h.bf16 %v2687_v52  ;;  %v2688_v54 = vunpack.i.l.bf16 %v2687_v52  ;;  %v2692_v55 = vpop.permute.xlu1 %2691 }
 0x2d0   :  { %2752 = vpow2.f32 %v360_v51  ;;  %v2694_v56 = vunpack.i.h.bf16 %v2692_v55  ;;  %v2693_v57 = vunpack.i.l.bf16 %v2692_v55 }
 0x2d1   :  { %v2532_v58 = vpack.c.bf16 %v2689_v53, %v2688_v54 }
 0x2d2   :  { %v2544_v59 = vpack.c.bf16 %v2694_v56, %v2693_v57 }
 0x2d3   :  { %2534 = vmatprep.subr.msk.bf16.mxu0 %vm3019_vm2, %v2532_v58  ;;  %v2697_v60 = vpop.permute.xlu1 %2696 }
 0x2d4   :  { %2537 = vmatpush3.bf16.xpose.msk.msra.mxu0 %vm3019_vm2, %v2532_v58  ;;  %v2699_v61 = vunpack.i.h.bf16 %v2697_v60  ;;  %v2698_v62 = vunpack.i.l.bf16 %v2697_v60 }
 0x2d5   :  { %2545 = vmatprep.subr.bf16.mxu0 %v2544_v59 }
 0x2d6   :  { %v2552_v2 = vpack.c.bf16 %v2699_v61, %v2698_v62 }
 0x2d9   :  { %v2751_v63 = vpop.eup %2750 }
 0x2da   :  { %v2753_v0 = vpop.eup %2752  ;;  %v367_v1 = vsel %vm238_vm3, %v2751_v63, 0.0 }
 0x2db   :  { %2365 = vmatmul.mubr.msk.f32.vlgmr.msra.gmra.mrb[8].mxu0 %vm154_vm1, %v3006_v31  ;;  %368 = vadd.xlane.f32.xlu1 %v367_v1  ;;  %v364_v3 = vsel %vm238_vm3, %v2753_v0, 0.0 }
 0x2dc   :  { %365 = vadd.xlane.f32.xlu0 %v364_v3  ;;  %2547 = vmatpush3.bf16.msra.mxu0 %v2544_v59 }
 0x2dd   :  { %2554 = vmatprep.subr.msk.bf16.mxu0 %vm3019_vm2, %v2552_v2 }
 0x2ec   :  { %2701 = vrot.lane.b32.xlu1 %v2680_v34, %s2884_s27 }
 0x2f0   :  { %746 = vrot.lane.b32.xlu1 %v2999_v26, %s2885_s28 }
 0x2f2   :  { %544 = vrot.lane.b32.xlu0 %v2999_v26, %s2886_s29 }
 0x2f6   :  { %546 = vrot.lane.b32.xlu0 %v3006_v31, %s2886_s29 }
 0x2fa   :  { %748 = vrot.lane.b32.xlu0 %v3006_v31, %s2885_s28 }
 0x368   :  { %v369_v8 = vpop.xlane.xlu1 %368 }
 0x369   :  { %2754 = vrcp.f32 %v369_v8  ;;  %v366_v9 = vpop.xlane.xlu0 %365 }
 0x36a   :  { %2756 = vrcp.f32 %v366_v9 }
 0x36c   :  { %v2702_v10 = vpop.permute.xlu1 %2701 }
 0x36d   :  { %v2704_v17 = vunpack.i.h.bf16 %v2702_v10  ;;  %v2703_v19 = vunpack.i.l.bf16 %v2702_v10  ;;  %v545_v26 = vpop.permute.xlu0 %544 }
 0x36f   :  { %v2562_v25 = vpack.c.bf16 %v2704_v17, %v2703_v19 }
 0x370   :  { %v747_v28 = vpop.permute.xlu1 %746 }
 0x371   :  { %v547_v27 = vpop.permute.xlu0 %546 }
 0x373   :  { %v2755_v11 = vpop.eup %2754 }
 0x374   :  { %v2757_v12 = vpop.eup %2756  ;;  %v3058_v23 = vmul.f32 %v2755_v11, %v2751_v63 }
 0x375   :  { %v3056_v20 = vmul.f32 %v2757_v12, %v2753_v0  ;;  %v749_v30 = vpop.permute.xlu0 %748 }
 0x377   :  { %2378 = vmatprep.mubr.msk.f32.mxu0 %vm238_vm3, %v3056_v20 }
 0x378   :  { %2379 = vmatmul.mubr.msk.f32.vlgmr.msra.gmra.mrb[10].mxu0 %vm238_vm3, %v3058_v23 }
 0x379   :  { %2557 = vmatpush3.bf16.xpose.msk.msra.mxu0 %vm3019_vm2, %v2552_v2  ;;  %2392 = vmatprep.mubr.msk.f32.mxu0 %vm154_vm1, %v545_v26 }
 0x37a   :  { %2564 = vmatprep.subr.msk.bf16.mxu0 %vm3019_vm2, %v2562_v25 }
 0x380   :  { %2393 = vmatmul.mubr.msk.f32.vlgmr.msra.gmra.mrb[12].mxu0 %vm154_vm1, %v547_v27 }
 0x381   :  { %2567 = vmatpush3.bf16.xpose.msk.msra.mxu0 %vm3019_vm2, %v2562_v25  ;;  %2406 = vmatprep.mubr.msk.f32.mxu0 %vm154_vm1, %v747_v28  ;;  %v3112_v25 = vadd.f32 %v3054_v7, %v2993_v22 }
 0x383   :  { %v2715_v26 = vpack.i.bf16 %v3112_v25, %v3074_v29 }
 0x388   :  { %2407 = vmatmul.mubr.msk.f32.vlgmr.msra.gmra.mrb[14].mxu0 %vm154_vm1, %v749_v30 }
 0x389   :  { %2420 = vmatprep.mubr.msk.f32.mxu0 %vm154_vm1, %v3074_v29 }
 0x3ae   :  { %v2366_v31 = vpop.f32.mrb[8].mxu0 }
 0x3af   :  { %v229_v32 = vpop.f32.mrb[9].mxu0  ;;  %v242_v34 = vsel %vm238_vm3, %v2366_v31, -inf }
 0x3b0   :  { %243 = vmax.xlane.f32.xlu0 %v242_v34  ;;  %v239_v35 = vsel %vm238_vm3, %v229_v32, -inf }
 0x3b1   :  { %240 = vmax.xlane.f32.xlu1 %v239_v35 }
 0x43d   :  { %v244_v41 = vpop.xlane.xlu0 %243 }
 0x43e   :  { %v241_v42 = vpop.xlane.xlu1 %240  ;;  %v246_v43 = vsub.f32 %v2366_v31, %v244_v41 }
 0x43f   :  { %v245_v45 = vsub.f32 %v229_v32, %v241_v42 }
 0x440   :  { %v249_v47 = vmul.f32 1.442695, %v246_v43 }
 0x441   :  { %v247_v48 = vmul.f32 1.442695, %v245_v45 }
 0x442   :  { %2758 = vpow2.f32 %v249_v47 }
 0x443   :  { %2760 = vpow2.f32 %v247_v48 }
 0x44b   :  { %v3087_v44 = vpop.f32.mrb[10].mxu0 }
 0x44c   :  { %v3089_v46 = vpop.f32.mrb[11].mxu0  ;;  %v2759_v55 = vpop.eup %2758 }
 0x44d   :  { %v2761_v57 = vpop.eup %2760  ;;  %v254_v58 = vsel %vm238_vm3, %v2759_v55, 0.0 }
 0x44e   :  { %v251_v59 = vsel %vm238_vm3, %v2761_v57, 0.0 }
 0x453   :  { %v2394_v49 = vpop.f32.mrb[12].mxu0 }
 0x454   :  { %v626_v50 = vpop.f32.mrb[13].mxu0  ;;  %v638_v24 = vsel %vm238_vm3, %v2394_v49, -inf }
 0x455   :  { %639 = vmax.xlane.f32.xlu1 %v638_v24  ;;  %v635_v51 = vsel %vm238_vm3, %v626_v50, -inf }
 0x456   :  { %636 = vmax.xlane.f32.xlu0 %v635_v51 }
 0x45b   :  { %v2408_v52 = vpop.f32.mrb[14].mxu0 }
 0x45c   :  { %v828_v53 = vpop.f32.mrb[15].mxu0  ;;  %v840_v54 = vsel %vm238_vm3, %v2408_v52, -inf }
 0x45d   :  { %841 = vmax.xlane.f32.xlu1 %v840_v54  ;;  %v837_v56 = vsel %vm238_vm3, %v828_v53, -inf }
 0x45e   :  { %838 = vmax.xlane.f32.xlu0 %v837_v56 }
 0x461   :  { %255 = vadd.xlane.f32.xlu1 %v254_v58 }
 0x462   :  { %252 = vadd.xlane.f32.xlu0 %v251_v59 }
 0x4e2   :  { %v640_v60 = vpop.xlane.xlu1 %639 }
 0x4e3   :  { %v642_v61 = vsub.f32 %v2394_v49, %v640_v60  ;;  %v637_v62 = vpop.xlane.xlu0 %636 }
 0x4e4   :  { %v641_v63 = vsub.f32 %v626_v50, %v637_v62 }
 0x4e5   :  { %v645_v0 = vmul.f32 1.442695, %v642_v61 }
 0x4e6   :  { %v643_v1 = vmul.f32 1.442695, %v641_v63 }
 0x4e7   :  { %2762 = vpow2.f32 %v645_v0 }
 0x4e8   :  { %2764 = vpow2.f32 %v643_v1 }
 0x4ea   :  { %v842_v2 = vpop.xlane.xlu1 %841 }
 0x4eb   :  { %v839_v3 = vpop.xlane.xlu0 %838  ;;  %v844_v28 = vsub.f32 %v2408_v52, %v842_v2 }
 0x4ec   :  { %v843_v27 = vsub.f32 %v828_v53, %v839_v3 }
 0x4ed   :  { %v847_v31 = vmul.f32 1.442695, %v844_v28 }
 0x4ee   :  { %v256_v4 = vpop.xlane.xlu1 %255  ;;  %v845_v30 = vmul.f32 1.442695, %v843_v27 }
 0x4ef   :  { %v253_v5 = vpop.xlane.xlu0 %252  ;;  %2766 = vrcp.f32 %v256_v4 }
 0x4f0   :  { %2768 = vrcp.f32 %v253_v5 }
 0x4f1   :  { %v3097_v6 = vpop.eup %2762  ;;  %2770 = vpow2.f32 %v845_v30 }
 0x4f2   :  { %v2765_v8 = vpop.eup %2764  ;;  %v650_v9 = vsel %vm238_vm3, %v3097_v6, 0.0  ;;  %2772 = vpow2.f32 %v847_v31 }
 0x4f3   :  { %651 = vadd.xlane.f32.xlu1 %v650_v9  ;;  %v647_v10 = vsel %vm238_vm3, %v2765_v8, 0.0 }
 0x4f4   :  { %648 = vadd.xlane.f32.xlu0 %v647_v10 }
 0x4f9   :  { %v2767_v11 = vpop.eup %2766 }
 0x4fa   :  { %v2769_v12 = vpop.eup %2768  ;;  %v3104_v19 = vmul.f32 %v2767_v11, %v2759_v55 }
 0x4fb   :  { %v3102_v17 = vmul.f32 %v2769_v12, %v2761_v57  ;;  %v2771_v22 = vpop.eup %2770 }
 0x4fc   :  { %v2773_v7 = vpop.eup %2772  ;;  %v849_v32 = vsel %vm238_vm3, %v2771_v22, 0.0 }
 0x4fd   :  { %2385 = vmatprep.mubr.msk.f32.mxu1 %vm238_vm3, %v3102_v17  ;;  %v852_v34 = vsel %vm238_vm3, %v2773_v7, 0.0 }
 0x4fe   :  { %2386 = vmatmul.mubr.msk.f32.vlgmr.msra.gmra.mrb[2].mxu1 %vm238_vm3, %v3104_v19 }
 0x504   :  { %2711 = vrot.lane.b32.xlu1 %v3008_v33, %s2887_s30 }
 0x508   :  { %2716 = vrot.lane.b32.xlu1 %v2715_v26, %s2881_s24  ;;  %s2890_s24 = smov 48  }
 0x50a   :  { %2706 = vrot.lane.b32.xlu0 %v3008_v33, %s2888_s7 }
 0x529   :  { %850 = vadd.xlane.f32.xlu0 %v849_v32 }
 0x52c   :  { %853 = vadd.xlane.f32.xlu1 %v852_v34 }
 0x53d   :  { %1059 = vrot.lane.b32.xlu1 %v3074_v29, %s2880_s0 }
 0x53f   :  { %2721 = vrot.lane.b32.xlu0 %v2715_v26, %s2882_s25 }
 0x541   :  { %2726 = vrot.lane.b32.xlu1 %v2715_v26, %s2883_s26 }
 0x543   :  { %1061 = vrot.lane.b32.xlu0 %v3112_v25, %s2880_s0 }
 0x545   :  { %1342 = vrot.lane.b32.xlu1 %v3074_v29, %s2886_s29 }
 0x547   :  { %2731 = vrot.lane.b32.xlu0 %v2715_v26, %s2884_s27 }
 0x549   :  { %1544 = vrot.lane.b32.xlu1 %v3074_v29, %s2885_s28 }
 0x54b   :  { %1344 = vrot.lane.b32.xlu0 %v3112_v25, %s2886_s29 }
 0x54f   :  { %1546 = vrot.lane.b32.xlu0 %v3112_v25, %s2885_s28 }
 0x580   :  { %v652_v33 = vpop.xlane.xlu1 %651 }
 0x581   :  { %2774 = vrcp.f32 %v652_v33  ;;  %v649_v35 = vpop.xlane.xlu0 %648 }
 0x582   :  { %2776 = vrcp.f32 %v649_v35 }
 0x584   :  { %v2712_v36 = vpop.permute.xlu1 %2711 }
 0x585   :  { %v2707_v37 = vpop.permute.xlu0 %2706  ;;  %v2714_v41 = vunpack.i.h.bf16 %v2712_v36  ;;  %v2713_v42 = vunpack.i.l.bf16 %v2712_v36 }
 0x586   :  { %v2709_v43 = vunpack.i.h.bf16 %v2707_v37  ;;  %v2708_v45 = vunpack.i.l.bf16 %v2707_v37 }
 0x587   :  { %v2568_v49 = vpack.c.bf16 %v2714_v41, %v2713_v42 }
 0x588   :  { %v2558_v47 = vpack.c.bf16 %v2709_v43, %v2708_v45  ;;  %v2717_v48 = vpop.permute.xlu1 %2716 }
 0x589   :  { %v2719_v24 = vunpack.i.h.bf16 %v2717_v48  ;;  %v2718_v51 = vunpack.i.l.bf16 %v2717_v48 }
 0x58a   :  { %2559 = vmatprep.subr.bf16.mxu1 %v2558_v47 }
 0x58b   :  { %v2775_v29 = vpop.eup %2774  ;;  %2561 = vmatpush3.bf16.msra.mxu1 %v2558_v47  ;;  %v2578_v54 = vpack.c.bf16 %v2719_v24, %v2718_v51 }
 0x58c   :  { %v2777_v50 = vpop.eup %2776  ;;  %2569 = vmatprep.subr.bf16.mxu1 %v2568_v49  ;;  %v3141_v53 = vmul.f32 %v2775_v29, %v3097_v6 }
 0x58d   :  { %v3138_v52 = vmul.f32 %v2777_v50, %v2765_v8 }
 0x58f   :  { %2399 = vmatprep.mubr.msk.f32.mxu1 %vm238_vm3, %v3138_v52 }
 0x590   :  { %2400 = vmatmul.mubr.msk.f32.vlgmr.msra.gmra.mrb[2].mxu1 %vm238_vm3, %v3141_v53 }
 0x591   :  { %2571 = vmatpush3.bf16.msra.mxu1 %v2568_v49 }
 0x592   :  { %2580 = vmatprep.subr.msk.bf16.mxu1 %vm3019_vm2, %v2578_v54 }
 0x5b6   :  { %v851_v55 = vpop.xlane.xlu0 %850 }
 0x5b7   :  { %2778 = vrcp.f32 %v851_v55 }
 0x5b9   :  { %v854_v56 = vpop.xlane.xlu1 %853 }
 0x5ba   :  { %2780 = vrcp.f32 %v854_v56  ;;  %v2722_v57 = vpop.permute.xlu0 %2721 }
 0x5bb   :  { %v2724_v58 = vunpack.i.h.bf16 %v2722_v57  ;;  %v2723_v59 = vunpack.i.l.bf16 %v2722_v57 }
 0x5bd   :  { %v2572_v60 = vpack.c.bf16 %v2724_v58, %v2723_v59  ;;  %v1060_v61 = vpop.permute.xlu1 %1059 }
 0x5be   :  { %v1062_v0 = vpop.permute.xlu0 %1061 }
 0x5bf   :  { %2574 = vmatprep.subr.msk.bf16.mxu0 %vm3019_vm2, %v2572_v60 }
 0x5c0   :  { %2577 = vmatpush3.bf16.xpose.msk.msra.mxu0 %vm3019_vm2, %v2572_v60 }
 0x5c1   :  { %v2779_v62 = vpop.eup %2778  ;;  %v2727_v63 = vpop.permute.xlu1 %2726 }
 0x5c2   :  { %v3153_v1 = vmul.f32 %v2779_v62, %v2771_v22  ;;  %v2729_v2 = vunpack.i.h.bf16 %v2727_v63  ;;  %v2728_v3 = vunpack.i.l.bf16 %v2727_v63  ;;  %v2732_v8 = vpop.permute.xlu0 %2731 }
 0x5c3   :  { %v2734_v9 = vunpack.i.h.bf16 %v2732_v8  ;;  %v2733_v10 = vunpack.i.l.bf16 %v2732_v8 }
 0x5c4   :  { %v2781_v4 = vpop.eup %2780  ;;  %2413 = vmatprep.mubr.msk.f32.mxu1 %vm238_vm3, %v3153_v1  ;;  %v2592_v6 = vpack.c.bf16 %v2729_v2, %v2728_v3 }
 0x5c5   :  { %v3157_v5 = vmul.f32 %v2781_v4, %v2773_v7  ;;  %v2602_v11 = vpack.c.bf16 %v2734_v9, %v2733_v10  ;;  %v1343_v12 = vpop.permute.xlu1 %1342 }
 0x5c7   :  { %2414 = vmatmul.mubr.msk.f32.vlgmr.msra.gmra.mrb[2].mxu1 %vm238_vm3, %v3157_v5  ;;  %2421 = vmatmul.mubr.msk.f32.vlgmr.msra.gmra.mrb[16].mxu0 %vm154_vm1, %v3112_v25  ;;  %v1345_v25 = vpop.permute.xlu0 %1344 }
 0x5c8   :  { %2583 = vmatpush3.bf16.xpose.msk.msra.mxu1 %vm3019_vm2, %v2578_v54  ;;  %2427 = vmatprep.mubr.msk.f32.mxu1 %vm154_vm1, %v1060_v61 }
 0x5c9   :  { %2594 = vmatprep.subr.msk.bf16.mxu1 %vm3019_vm2, %v2592_v6  ;;  %v1545_v26 = vpop.permute.xlu1 %1544 }
 0x5cb   :  { %v1547_v27 = vpop.permute.xlu0 %1546 }
 0x5cf   :  { %2428 = vmatmul.mubr.msk.f32.vlgmr.msra.gmra.mrb[4].mxu1 %vm154_vm1, %v1062_v0 }
 0x5d0   :  { %2597 = vmatpush3.bf16.xpose.msk.msra.mxu1 %vm3019_vm2, %v2592_v6  ;;  %2448 = vmatprep.mubr.msk.f32.mxu1 %vm154_vm1, %v1343_v12 }
 0x5d1   :  { %2604 = vmatprep.subr.msk.bf16.mxu1 %vm3019_vm2, %v2602_v11 }
 0x5d7   :  { %2449 = vmatmul.mubr.msk.f32.vlgmr.msra.gmra.mrb[6].mxu1 %vm154_vm1, %v1345_v25 }
 0x5d8   :  { %2607 = vmatpush3.bf16.xpose.msk.msra.mxu1 %vm3019_vm2, %v2602_v11  ;;  %2462 = vmatprep.mubr.msk.f32.mxu1 %vm154_vm1, %v1545_v26 }
 0x5df   :  { %2463 = vmatmul.mubr.msk.f32.vlgmr.msra.gmra.mrb[8].mxu1 %vm154_vm1, %v1547_v27 }
 0x69a   :  { %v2415_v28 = vpop.f32.mrb[2].mxu1  ;;  %v2422_v30 = vpop.f32.mrb[16].mxu0 }
 0x69b   :  { %v3180_v31 = vadd.f32 %v2415_v28, %v3087_v44  ;;  %v937_v22 = vpop.f32.mrb[3].mxu1  ;;  %v1028_v7 = vpop.f32.mrb[17].mxu0  ;;  %v1040_v37 = vsel %vm238_vm3, %v2422_v30, -inf }
 0x69c   :  { %v3183_v32 = vadd.f32 %v937_v22, %v3089_v46  ;;  %v1037_v36 = vsel %vm238_vm3, %v1028_v7, -inf }
 0x6a2   :  { %v2429_v34 = vpop.f32.mrb[4].mxu1 }
 0x6a3   :  { %v1141_v33 = vpop.f32.mrb[5].mxu1  ;;  %v1153_v38 = vsel %vm238_vm3, %v2429_v34, -inf }
 0x6a4   :  { %1154 = vmax.xlane.f32.xlu0 %v1153_v38  ;;  %v1150_v35 = vsel %vm238_vm3, %v1141_v33, -inf }
 0x6a5   :  { %1151 = vmax.xlane.f32.xlu1 %v1150_v35 }
 0x6a8   :  { %1038 = vmax.xlane.f32.xlu0 %v1037_v36 }
 0x6a9   :  { %1041 = vmax.xlane.f32.xlu1 %v1040_v37 }
 0x6aa   :  { %v2450_v44 = vpop.f32.mrb[6].mxu1 }
 0x6ab   :  { %v3189_v41 = vpop.f32.mrb[7].mxu1  ;;  %v1436_v46 = vsel %vm238_vm3, %v2450_v44, -inf }
 0x6ac   :  { %v1433_v42 = vsel %vm238_vm3, %v3189_v41, -inf }
 0x6ad   :  { %1434 = vmax.xlane.f32.xlu0 %v1433_v42  ;;  %1437 = vmax.xlane.f32.xlu1 %v1436_v46  ;;  %v1748_v46 = vsub.s32 2, %v2982_v18 }
 0x6b2   :  { %v2464_v43 = vpop.f32.mrb[8].mxu1 }
 0x6b3   :  { %v1626_v45 = vpop.f32.mrb[9].mxu1  ;;  %v1638_v47 = vsel %vm238_vm3, %v2464_v43, -inf }
 0x6b4   :  { %1639 = vmax.xlane.f32.xlu1 %v1638_v47  ;;  %v1635_v48 = vsel %vm238_vm3, %v1626_v45, -inf }
 0x6b5   :  { %1636 = vmax.xlane.f32.xlu0 %v1635_v48 }
 0x731   :  { %v1155_v49 = vpop.xlane.xlu0 %1154 }
 0x732   :  { %v1152_v29 = vpop.xlane.xlu1 %1151  ;;  %v1157_v24 = vsub.f32 %v2429_v34, %v1155_v49 }
 0x733   :  { %v1156_v50 = vsub.f32 %v1141_v33, %v1152_v29 }
 0x734   :  { %v1160_v59 = vmul.f32 1.442695, %v1157_v24 }
 0x735   :  { %v1039_v51 = vpop.xlane.xlu0 %1038  ;;  %v1158_v57 = vmul.f32 1.442695, %v1156_v50 }
 0x736   :  { %v1043_v54 = vsub.f32 %v1028_v7, %v1039_v51  ;;  %v1042_v55 = vpop.xlane.xlu1 %1041 }
 0x737   :  { %v1044_v56 = vsub.f32 %v2422_v30, %v1042_v55 }
 0x738   :  { %v1045_v58 = vmul.f32 1.442695, %v1043_v54 }
 0x739   :  { %v1047_v60 = vmul.f32 1.442695, %v1044_v56 }
 0x73a   :  { %2782 = vpow2.f32 %v1045_v58  ;;  %v1438_v61 = vpop.xlane.xlu1 %1437  ;;  %v1435_v0 = vpop.xlane.xlu0 %1434 }
 0x73b   :  { %2784 = vpow2.f32 %v1047_v60  ;;  %v1440_v62 = vsub.f32 %v2450_v44, %v1438_v61  ;;  %v1439_v36 = vsub.f32 %v3189_v41, %v1435_v0 }
 0x73c   :  { %2786 = vpow2.f32 %v1158_v57 }
 0x73d   :  { %2788 = vpow2.f32 %v1160_v59  ;;  %v1443_v63 = vmul.f32 1.442695, %v1440_v62  ;;  %v1441_v37 = vmul.f32 1.442695, %v1439_v36 }
 0x73f   :  { %2790 = vpow2.f32 %v1443_v63 }
 0x741   :  { %v1640_v2 = vpop.xlane.xlu1 %1639 }
 0x742   :  { %v1642_v3 = vsub.f32 %v2464_v43, %v1640_v2  ;;  %v1637_v4 = vpop.xlane.xlu0 %1636  ;;  %v3229_v43 = vrot.slane %v2991_v21, %v1748_v46 }
 0x743   :  { %v1641_v6 = vsub.f32 %v1626_v45, %v1637_v4 }
 0x744   :  { %v3196_v8 = vpop.eup %2782  ;;  %v1645_v9 = vmul.f32 1.442695, %v1642_v3  ;;  %v1751_v45 = vadd.f32 %v3180_v31, %v3229_v43  ;;  %v1750_v48 = vadd.f32 %v3183_v32, %v3229_v43 }
 0x745   :  { %v3198_v10 = vpop.eup %2784  ;;  %v1643_v11 = vmul.f32 1.442695, %v1641_v6  ;;  %v1049_v12 = vsel %vm238_vm3, %v3196_v8, 0.0 }
 0x746   :  { %v2787_v25 = vpop.eup %2786  ;;  %2792 = vpow2.f32 %v1645_v9  ;;  %1050 = vadd.xlane.f32.xlu0 %v1049_v12  ;;  %v1052_v26 = vsel %vm238_vm3, %v3198_v10, 0.0  ;;  %v3234_v47 = vadd.f32 %v1751_v45, %v2964_v14  ;;  %v3243_v49 = vadd.f32 %v1750_v48, %v2957_v13 }
 0x747   :  { %v2789_v27 = vpop.eup %2788  ;;  %1053 = vadd.xlane.f32.xlu1 %v1052_v26  ;;  %2794 = vpow2.f32 %v1643_v11  ;;  %v1162_v28 = vsel %vm238_vm3, %v2787_v25, 0.0 }
 0x748   :  { %v1165_v30 = vsel %vm238_vm3, %v2789_v27, 0.0  ;;  %2796 = vpow2.f32 %v1441_v37  ;;  %v1761_v41 = vsel %vm46_vm0, %v3234_v47, 0.0  ;;  %v1758_v29 = vsel %vm46_vm0, %v3243_v49, 0.0 }
 0x749   :  { %v3206_v22 = vpop.eup %2790 }
 0x74a   :  { %1163 = vadd.xlane.f32.xlu0 %v1162_v28  ;;  %v1448_v7 = vsel %vm238_vm3, %v3206_v22, 0.0 }
 0x74b   :  { %1166 = vadd.xlane.f32.xlu1 %v1165_v30 }
 0x74f   :  { %1449 = vadd.xlane.f32.xlu1 %v1448_v7 }
 0x750   :  { %v3210_v34 = vpop.eup %2792 }
 0x751   :  { %v1650_v33 = vsel %vm238_vm3, %v3210_v34, 0.0  ;;  %v3214_v38 = vpop.eup %2794 }
 0x752   :  { %v1647_v35 = vsel %vm238_vm3, %v3214_v38, 0.0  ;;  %v3223_v44 = vpop.eup %2796 }
 0x753   :  { %1651 = vadd.xlane.f32.xlu1 %v1650_v33  ;;  %v1445_v42 = vsel %vm238_vm3, %v3223_v44, 0.0 }
 0x757   :  { %1648 = vadd.xlane.f32.xlu1 %v1647_v35 }
 0x760   :  { %2736 = vrot.lane.b32.xlu0 %v3083_v39, %s2882_s25 }
 0x768   :  { %2741 = vrot.lane.b32.xlu1 %v3083_v39, %s2888_s7 }
 0x77f   :  { %1446 = vadd.xlane.f32.xlu0 %v1445_v42 }
 0x78c   :  { %1762 = vadd.xlane.f32.xlu1 %v1761_v41  ;;  %v1813_v41 = vsub.s32 3, %v2982_v18 }
 0x78e   :  { %v3292_v48 = vrot.slane %v2991_v21, %v1813_v41  ;;  %v1939_v41 = vld [vmem:[%s3509_s3 + $0x18] sm:$0xff] }
 0x795   :  { %2746 = vrot.lane.b32.xlu0 %v3083_v39, %s2887_s30 }
 0x7b4   :  { %1759 = vadd.xlane.f32.xlu0 %v1758_v29 }
 0x7d3   :  { %v1051_v31 = vpop.xlane.xlu0 %1050 }
 0x7d4   :  { %v1054_v14 = vpop.xlane.xlu1 %1053  ;;  %2798 = vrcp.f32 %v1051_v31 }
 0x7d7   :  { %v1164_v50 = vpop.xlane.xlu0 %1163 }
 0x7d8   :  { %2800 = vrcp.f32 %v1164_v50  ;;  %v1167_v24 = vpop.xlane.xlu1 %1166 }
 0x7d9   :  { %2802 = vrcp.f32 %v1167_v24 }
 0x7da   :  { %2804 = vrcp.f32 %v1054_v14 }
 0x7db   :  { %v2737_v51 = vpop.permute.xlu0 %2736 }
 0x7dc   :  { %v2739_v54 = vunpack.i.h.bf16 %v2737_v51  ;;  %v2738_v39 = vunpack.i.l.bf16 %v2737_v51  ;;  %v1450_v55 = vpop.xlane.xlu1 %1449 }
 0x7dd   :  { %2806 = vrcp.f32 %v1450_v55 }
 0x7de   :  { %v2584_v56 = vpack.c.bf16 %v2739_v54, %v2738_v39  ;;  %v2799_v32 = vpop.eup %2798 }
 0x7df   :  { %v3255_v62 = vmul.f32 %v2799_v32, %v3196_v8 }
 0x7e0   :  { %2585 = vmatprep.subr.bf16.mxu0 %v2584_v56  ;;  %v1652_v13 = vpop.xlane.xlu1 %1651 }
 0x7e1   :  { %2587 = vmatpush3.bf16.msra.mxu0 %v2584_v56 }
 0x7e2   :  { %v2801_v57 = vpop.eup %2800  ;;  %2589 = vmatprep.subr.bf16.mxu0 %v3085_v40 }
 0x7e3   :  { %v2803_v58 = vpop.eup %2802  ;;  %v3248_v59 = vmul.f32 %v2801_v57, %v2787_v25 }
 0x7e4   :  { %v3250_v60 = vmul.f32 %v2803_v58, %v2789_v27  ;;  %v1649_v61 = vpop.xlane.xlu1 %1648  ;;  %v2805_v0 = vpop.eup %2804 }
 0x7e5   :  { %2434 = vmatprep.mubr.msk.f32.mxu0 %vm238_vm3, %v3248_v59  ;;  %v3263_v6 = vmul.f32 %v2805_v0, %v3198_v10  ;;  %2808 = vrcp.f32 %v1649_v61 }
 0x7e6   :  { %2435 = vmatmul.mubr.msk.f32.vlgmr.msra.gmra.mrb[18].mxu0 %vm238_vm3, %v3250_v60 }
 0x7e7   :  { %2591 = vmatpush3.bf16.msra.mxu0 %v3085_v40  ;;  %2441 = vmatprep.mubr.msk.f32.mxu0 %vm238_vm3, %v3255_v62  ;;  %v2807_v25 = vpop.eup %2806 }
 0x7e8   :  { %v2742_v63 = vpop.permute.xlu1 %2741  ;;  %v3271_v28 = vmul.f32 %v2807_v25, %v3206_v22 }
 0x7e9   :  { %v2744_v2 = vunpack.i.h.bf16 %v2742_v63  ;;  %v2743_v3 = vunpack.i.l.bf16 %v2742_v63  ;;  %v1830_v63 = vld [vmem:[%s3508_s2 + $0x18] sm:$0xff] }
 0x7eb   :  { %v2598_v4 = vpack.c.bf16 %v2744_v2, %v2743_v3 }
 0x7ed   :  { %2599 = vmatprep.subr.bf16.mxu0 %v2598_v4 }
 0x7ee   :  { %2442 = vmatmul.mubr.msk.f32.vlgmr.msra.gmra.mrb[18].mxu0 %vm238_vm3, %v3263_v6 }
 0x7ef   :  { %2601 = vmatpush3.bf16.msra.mxu0 %v2598_v4  ;;  %v2809_v26 = vpop.eup %2808 }
 0x7f0   :  { %v3276_v30 = vmul.f32 %v2809_v26, %v3214_v38 }
 0x80c   :  { %v1447_v8 = vpop.xlane.xlu0 %1446 }
 0x80d   :  { %2810 = vrcp.f32 %v1447_v8 }
 0x80e   :  { %2812 = vrcp.f32 %v1652_v13 }
 0x810   :  { %v2747_v40 = vpop.permute.xlu0 %2746 }
 0x811   :  { %v2749_v9 = vunpack.i.h.bf16 %v2747_v40  ;;  %v2748_v11 = vunpack.i.l.bf16 %v2747_v40 }
 0x813   :  { %v2608_v12 = vpack.c.bf16 %v2749_v9, %v2748_v11 }
 0x815   :  { %2609 = vmatprep.subr.bf16.mxu0 %v2608_v12 }
 0x817   :  { %v2811_v27 = vpop.eup %2810 }
 0x818   :  { %v3268_v10 = vmul.f32 %v2811_v27, %v3223_v44  ;;  %v2813_v7 = vpop.eup %2812 }
 0x819   :  { %v3283_v33 = vmul.f32 %v2813_v7, %v3210_v34  ;;  %v1763_v44 = vpop.xlane.xlu1 %1762  ;;  %v1821_v34 = vsub.s32 4, %v2982_v18 }
 0x81a   :  { %2455 = vmatprep.mubr.msk.f32.mxu0 %vm238_vm3, %v3268_v10  ;;  %v1772_v54 = vmul.f32 0.03125, %v1763_v44  ;;  %v1936_v44 = vld [vmem:[%s3509_s3] sm:$0xff] }
 0x81b   :  { %2456 = vmatmul.mubr.msk.f32.vlgmr.msra.gmra.mrb[18].mxu0 %vm238_vm3, %v3271_v28 }
 0x81c   :  { %2611 = vmatpush3.bf16.msra.mxu0 %v2608_v12  ;;  %2469 = vmatprep.mubr.msk.f32.mxu0 %vm238_vm3, %v3276_v30 }
 0x823   :  { %2470 = vmatmul.mubr.msk.f32.vlgmr.msra.gmra.mrb[18].mxu0 %vm238_vm3, %v3283_v33 }
 0x841   :  { %v1760_v22 = vpop.xlane.xlu0 %1759 }
 0x842   :  { %v1771_v35 = vmul.f32 0.03125, %v1760_v22 }
 0x844   :  { %v1775_v36 = vsub.f32 %v3243_v49, %v1771_v35  ;;  %v3295_v49 = vrot.slane %v2991_v21, %v1821_v34  ;;  %v1776_v21 = vsub.f32 %v3234_v47, %v1772_v54 }
 0x846   :  { %v1779_v38 = vmul.f32 %v1775_v36, %v1775_v36  ;;  %v1780_v58 = vmul.f32 %v1776_v21, %v1776_v21 }
 0x848   :  { %v1783_v37 = vsel %vm46_vm0, %v1779_v38, 0.0  ;;  %v1786_v61 = vsel %vm46_vm0, %v1780_v58, 0.0  ;;  %v1949_v58 = vld [vmem:[%s3509_s3 + $0x68] sm:$0xff] }
 0x849   :  { %1784 = vadd.xlane.f32.xlu1 %v1783_v37 }
 0x8d6   :  { %v1785_v46 = vpop.xlane.xlu1 %1784 }
 0x8d7   :  { %v1795_v42 = vmul.f32 0.03125, %v1785_v46  ;;  %v1937_v46 = vld [vmem:[%s3509_s3 + $0x8] sm:$0xff] }
 0x8d9   :  { %v1799_v45 = vadd.f32 1e-05, %v1795_v42  ;;  %v1938_v42 = vld [vmem:[%s3509_s3 + $0x10] sm:$0xff] }
 0x8da   :  { %v2624_v34 = vpack.c.bf16 %v1939_v41, %v1938_v42 }
 0x8db   :  { %2814 = vrsqrt.f32 %v1799_v45  ;;  %v2620_v45 = vpack.c.bf16 %v1937_v46, %v1936_v44 }
 0x8dd   :  { %2621 = vmatprep.subr.bf16.mxu1 %v2620_v45 }
 0x8de   :  { %2623 = vmatpush3.bf16.msra.mxu1 %v2620_v45 }
 0x8df   :  { %2625 = vmatprep.subr.bf16.mxu1 %v2624_v34 }
 0x8e2   :  { %2627 = vmatpush3.bf16.msra.mxu1 %v2624_v34 }
 0x8e5   :  { %v2815_v29 = vpop.eup %2814 }
 0x8e6   :  { %v1807_v31 = vmul.f32 %v2815_v29, %v1775_v36  ;;  %v1940_v29 = vld [vmem:[%s3509_s3 + $0x20] sm:$0xff] }
 0x8e8   :  { %v1815_v14 = vmul.f32 %v3292_v48, %v1807_v31  ;;  %v1941_v31 = vld [vmem:[%s3509_s3 + $0x28] sm:$0xff] }
 0x8ea   :  { %v3299_v50 = vadd.f32 %v3295_v49, %v1815_v14  ;;  %v2628_v14 = vpack.c.bf16 %v1941_v31, %v1940_v29 }
 0x8ec   :  { %2480 = vmatprep.mubr.msk.f32.mxu0 %vm46_vm0, %v3299_v50  ;;  %2629 = vmatprep.subr.bf16.mxu1 %v2628_v14 }
 0x8ed   :  { %2631 = vmatpush3.bf16.msra.mxu1 %v2628_v14  ;;  %v1954_v14 = vsub.s32 5, %v2982_v18 }
 0x8f6   :  { %v2471_v24 = vpop.f32.mrb[18].mxu0 }
 0x8f7   :  { %v1735_v51 = vpop.f32.mrb[19].mxu0  ;;  %v1753_v39 = vadd.f32 %v2471_v24, %v3229_v43  ;;  %v1942_v24 = vld [vmem:[%s3509_s3 + $0x30] sm:$0xff] }
 0x8f8   :  { %v1752_v55 = vadd.f32 %v3229_v43, %v1735_v51  ;;  %v1827_v43 = vld [vmem:[%s3508_s2] sm:$0xff]  ;;  %v1943_v51 = vld [vmem:[%s3509_s3 + $0x38] sm:$0xff] }
 0x8f9   :  { %v1757_v32 = vadd.f32 %v1753_v39, %v2978_v16  ;;  %v1829_v16 = vld [vmem:[%s3508_s2 + $0x10] sm:$0xff]  ;;  %v2632_v54 = vpack.c.bf16 %v1943_v51, %v1942_v24  ;;  %v1944_v39 = vld [vmem:[%s3509_s3 + $0x40] sm:$0xff] }
 0x8fa   :  { %v1756_v56 = vadd.f32 %v1752_v55, %v2971_v15  ;;  %v1828_v15 = vld [vmem:[%s3508_s2 + $0x8] sm:$0xff]  ;;  %v2616_v0 = vpack.c.bf16 %v1830_v63, %v1829_v16 }
 0x8fb   :  { %v1767_v57 = vsel %vm46_vm0, %v1757_v32, 0.0  ;;  %v2612_v47 = vpack.c.bf16 %v1828_v15, %v1827_v43  ;;  %v1945_v55 = vld [vmem:[%s3509_s3 + $0x48] sm:$0xff]  ;;  %2633 = vmatprep.subr.bf16.mxu1 %v2632_v54  ;;  %v1950_v43 = vld [vmem:[%s3509_s3 + $0x70] sm:$0xff]  ;;  %v1951_v15 = vld [vmem:[%s3509_s3 + $0x78] sm:$0xff] }
 0x8fc   :  { %v1764_v13 = vsel %vm46_vm0, %v1756_v56, 0.0  ;;  %2635 = vmatpush3.bf16.msra.mxu1 %v2632_v54 }
 0x8fd   :  { %1765 = vadd.xlane.f32.xlu0 %v1764_v13  ;;  %2613 = vmatprep.subr.bf16.mxu0 %v2612_v47  ;;  %v1947_v13 = vld [vmem:[%s3509_s3 + $0x58] sm:$0xff] }
 0x8fe   :  { %2615 = vmatpush3.bf16.msra.mxu0 %v2612_v47  ;;  %v2648_v47 = vpack.c.bf16 %v1951_v15, %v1950_v43 }
 0x8ff   :  { %2617 = vmatprep.subr.bf16.mxu0 %v2616_v0 }
 0x901   :  { %1768 = vadd.xlane.f32.xlu0 %v1767_v57  ;;  %v1948_v57 = vld [vmem:[%s3509_s3 + $0x60] sm:$0xff] }
 0x902   :  { %2619 = vmatpush3.bf16.msra.mxu0 %v2616_v0 }
 0x905   :  { %1787 = vadd.xlane.f32.xlu0 %v1786_v61  ;;  %v2644_v61 = vpack.c.bf16 %v1949_v58, %v1948_v57 }
 0x98a   :  { %v1766_v2 = vpop.xlane.xlu0 %1765 }
 0x98b   :  { %v1773_v3 = vmul.f32 0.03125, %v1766_v2 }
 0x98d   :  { %v3323_v4 = vsub.f32 %v1756_v56, %v1773_v3  ;;  %v2636_v56 = vpack.c.bf16 %v1945_v55, %v1944_v39 }
 0x98e   :  { %v1769_v8 = vpop.xlane.xlu0 %1768 }
 0x98f   :  { %v1774_v40 = vmul.f32 0.03125, %v1769_v8  ;;  %v1781_v9 = vmul.f32 %v3323_v4, %v3323_v4  ;;  %2637 = vmatprep.subr.bf16.mxu1 %v2636_v56 }
 0x990   :  { %2639 = vmatpush3.bf16.msra.mxu1 %v2636_v56 }
 0x991   :  { %v3327_v11 = vsub.f32 %v1757_v32, %v1774_v40  ;;  %v1789_v12 = vsel %vm46_vm0, %v1781_v9, 0.0 }
 0x992   :  { %1790 = vadd.xlane.f32.xlu1 %v1789_v12  ;;  %v1788_v25 = vpop.xlane.xlu0 %1787 }
 0x993   :  { %v1796_v26 = vmul.f32 0.03125, %v1788_v25  ;;  %v1782_v27 = vmul.f32 %v3327_v11, %v3327_v11 }
 0x995   :  { %v1800_v7 = vadd.f32 1e-05, %v1796_v26  ;;  %v1792_v22 = vsel %vm46_vm0, %v1782_v27, 0.0 }
 0x996   :  { %1793 = vadd.xlane.f32.xlu0 %v1792_v22 }
 0x997   :  { %2816 = vrsqrt.f32 %v1800_v7 }
 0x9a1   :  { %v2817_v35 = vpop.eup %2816 }
 0x9a2   :  { %v1808_v36 = vmul.f32 %v2817_v35, %v1776_v21  ;;  %v1946_v21 = vld [vmem:[%s3509_s3 + $0x50] sm:$0xff]  ;;  %v1833_v35 = vsub.s32 1, %v2982_v18 }
 0x9a3   :  { %v2640_v32 = vpack.c.bf16 %v1947_v13, %v1946_v21 }
 0x9a4   :  { %v1816_v38 = vmul.f32 %v3292_v48, %v1808_v36 }
 0x9a5   :  { %2641 = vmatprep.subr.bf16.mxu1 %v2640_v32 }
 0x9a6   :  { %v3335_v37 = vadd.f32 %v3295_v49, %v1816_v38  ;;  %2643 = vmatpush3.bf16.msra.mxu1 %v2640_v32 }
 0x9a7   :  { %2645 = vmatprep.subr.bf16.mxu1 %v2644_v61 }
 0x9a8   :  { %2481 = vmatmul.mubr.msk.f32.vlgmr.msra.gmra.mrb[20].mxu0 %vm46_vm0, %v3335_v37 }
 0x9aa   :  { %2647 = vmatpush3.bf16.msra.mxu1 %v2644_v61 }
 0x9ab   :  { %2649 = vmatprep.subr.bf16.mxu1 %v2648_v47 }
 0x9ae   :  { %2651 = vmatpush3.bf16.msra.mxu1 %v2648_v47 }
 0xa1f   :  { %v1791_v16 = vpop.xlane.xlu1 %1790 }
 0xa20   :  { %v1797_v63 = vmul.f32 0.03125, %v1791_v16 }
 0xa22   :  { %v1801_v0 = vadd.f32 1e-05, %v1797_v63 }
 0xa23   :  { %v1794_v2 = vpop.xlane.xlu0 %1793 }
 0xa24   :  { %2818 = vrsqrt.f32 %v1801_v0  ;;  %v1798_v3 = vmul.f32 0.03125, %v1794_v2 }
 0xa26   :  { %v1802_v8 = vadd.f32 1e-05, %v1798_v3 }
 0xa28   :  { %2820 = vrsqrt.f32 %v1802_v8 }
 0xa2e   :  { %v2819_v40 = vpop.eup %2818 }
 0xa2f   :  { %v1809_v9 = vmul.f32 %v2819_v40, %v3323_v4  ;;  %v3399_v4 = vld [vmem:[%s3510_s4] sm:$0xff]  ;;  %s2889_s4 = smov 16  }
 0xa30   :  { %v1834_v36 = vrot.slane %v3399_v4, %v1833_v35  ;;  %v1955_v24 = vrot.slane %v3399_v4, %v1954_v14 }
 0xa31   :  { %v1817_v12 = vmul.f32 %v3292_v48, %v1809_v9 }
 0xa32   :  { %v2821_v25 = vpop.eup %2820 }
 0xa33   :  { %v1825_v26 = vadd.f32 %v3295_v49, %v1817_v12  ;;  %v1810_v27 = vmul.f32 %v2821_v25, %v3327_v11 }
 0xa35   :  { %2483 = vmatprep.mubr.msk.f32.mxu0 %vm46_vm0, %v1825_v26  ;;  %v1818_v7 = vmul.f32 %v3292_v48, %v1810_v27 }
 0xa37   :  { %v1826_v22 = vadd.f32 %v3295_v49, %v1818_v7 }
 0xa39   :  { %2484 = vmatmul.mubr.msk.f32.gmra.mrb[22].mxu0 %vm46_vm0, %v1826_v22 }
 0xa7b   :  { %v2482_v38 = vpop.f32.mrb[20].mxu0 }
 0xa7c   :  { %v1919_v44 = vadd.f32 %v2482_v38, %v1834_v36  ;;  %v1913_v11 = vpop.f32.mrb[21].mxu0  ;;  %v2107_v38 = vsub.s32 7, %v2982_v18 }
 0xa7d   :  { %v1914_v46 = vadd.f32 %v1913_v11, %v1834_v36 }
 0xa7e   :  { %v1933_v45 = vmax.f32 %v1919_v44, 0.0 }
 0xa7f   :  { %v1932_v42 = vmax.f32 %v1914_v46, 0.0 }
 0xa81   :  { %2518 = vmatprep.mubr.f32.mxu1 %v1932_v42 }
 0xa82   :  { %2519 = vmatmul.mubr.f32.vlgmr.msra.gmra.mrb[10].mxu1 %v1933_v45  ;;  %v3446_v45 = vrot.slane %v3399_v4, %v2107_v38 }
 0xb0c   :  { %v2485_v48 = vpop.f32.mrb[22].mxu0 }
 0xb0d   :  { %v1929_v49 = vadd.f32 %v2485_v48, %v1834_v36  ;;  %v1923_v41 = vpop.f32.mrb[23].mxu0 }
 0xb0e   :  { %v1924_v34 = vadd.f32 %v1923_v41, %v1834_v36 }
 0xb0f   :  { %v1935_v31 = vmax.f32 %v1929_v49, 0.0 }
 0xb10   :  { %v1934_v29 = vmax.f32 %v1924_v34, 0.0 }
 0xb12   :  { %2521 = vmatprep.mubr.f32.mxu1 %v1934_v29 }
 0xb13   :  { %2522 = vmatmul.mubr.f32.gmra.mrb[12].mxu1 %v1935_v31 }
 0xb55   :  { %v2520_v51 = vpop.f32.mrb[10].mxu1 }
 0xb56   :  { %v2028_v54 = vadd.f32 %v2520_v51, %v1955_v24  ;;  %v2022_v39 = vpop.f32.mrb[11].mxu1 }
 0xb57   :  { %v2023_v55 = vadd.f32 %v2022_v39, %v1955_v24 }
 0xb58   :  { %v2042_v56 = vadd.f32 %v2028_v54, %v3335_v37 }
 0xb59   :  { %v2041_v21 = vadd.f32 %v2023_v55, %v3299_v50 }
 0xb5a   :  { %v2048_v13 = vsel %vm46_vm0, %v2042_v56, 0.0 }
 0xb5b   :  { %2049 = vadd.xlane.f32.xlu0 %v2048_v13  ;;  %v2045_v32 = vsel %vm46_vm0, %v2041_v21, 0.0 }
 0xb5c   :  { %2046 = vadd.xlane.f32.xlu1 %v2045_v32 }
 0xbe6   :  { %v2523_v57 = vpop.f32.mrb[12].mxu1 }
 0xbe7   :  { %v2038_v58 = vadd.f32 %v2523_v57, %v1955_v24  ;;  %v2032_v61 = vpop.f32.mrb[13].mxu1 }
 0xbe8   :  { %v2050_v43 = vpop.xlane.xlu0 %2049  ;;  %v2033_v37 = vadd.f32 %v2032_v61, %v1955_v24 }
 0xbe9   :  { %v2058_v15 = vmul.f32 0.03125, %v2050_v43  ;;  %v2047_v47 = vpop.xlane.xlu1 %2046  ;;  %v2044_v16 = vadd.f32 %v2038_v58, %v1826_v22  ;;  %v2099_v22 = vsub.s32 6, %v2982_v18 }
 0xbea   :  { %v2057_v63 = vmul.f32 0.03125, %v2047_v47  ;;  %v2043_v12 = vadd.f32 %v2033_v37, %v1825_v26 }
 0xbeb   :  { %v2062_v0 = vsub.f32 %v2042_v56, %v2058_v15  ;;  %v2054_v2 = vsel %vm46_vm0, %v2044_v16, 0.0  ;;  %v3443_v44 = vrot.slane %v3399_v4, %v2099_v22 }
 0xbec   :  { %v2061_v3 = vsub.f32 %v2041_v21, %v2057_v63  ;;  %2055 = vadd.xlane.f32.xlu0 %v2054_v2  ;;  %v2051_v25 = vsel %vm46_vm0, %v2043_v12, 0.0 }
 0xbed   :  { %v2066_v50 = vmul.f32 %v2062_v0, %v2062_v0 }
 0xbee   :  { %v2065_v8 = vmul.f32 %v2061_v3, %v2061_v3 }
 0xbef   :  { %v2072_v40 = vsel %vm46_vm0, %v2066_v50, 0.0 }
 0xbf0   :  { %2073 = vadd.xlane.f32.xlu0 %v2072_v40  ;;  %v2069_v9 = vsel %vm46_vm0, %v2065_v8, 0.0 }
 0xbf1   :  { %2070 = vadd.xlane.f32.xlu1 %v2069_v9 }
 0xbf5   :  { %2052 = vadd.xlane.f32.xlu1 %v2051_v25 }
 0xc06   :  { %2117 = vrot.lane.b32.xlu1 %v3056_v20, %s2889_s4  ;;  %2119 = vrot.lane.b32.xlu0 %v3058_v23, %s2889_s4 }
 0xc0a   :  { %2123 = vrot.lane.b32.xlu1 %v3138_v52, %s2887_s30  ;;  %2129 = vrot.lane.b32.xlu0 %v3153_v1, %s2890_s24 }
 0xc0e   :  { %2125 = vrot.lane.b32.xlu1 %v3141_v53, %s2887_s30  ;;  %2135 = vrot.lane.b32.xlu0 %v3255_v62, %s2888_s7 }
 0xc12   :  { %2131 = vrot.lane.b32.xlu1 %v3157_v5, %s2890_s24  ;;  %2141 = vrot.lane.b32.xlu0 %v3248_v59, %s2883_s26 }
 0xc16   :  { %2137 = vrot.lane.b32.xlu1 %v3263_v6, %s2888_s7 }
 0xc1a   :  { %2143 = vrot.lane.b32.xlu1 %v3250_v60, %s2883_s26 }
 0xc1e   :  { %2149 = vrot.lane.b32.xlu1 %v3271_v28, %s2882_s25 }
 0xc79   :  { %v2056_v20 = vpop.xlane.xlu0 %2055 }
 0xc7a   :  { %v2060_v23 = vmul.f32 0.03125, %v2056_v20 }
 0xc7c   :  { %v3430_v52 = vsub.f32 %v2044_v16, %v2060_v23 }
 0xc7d   :  { %v2074_v53 = vpop.xlane.xlu0 %2073 }
 0xc7e   :  { %v2082_v1 = vmul.f32 0.03125, %v2074_v53  ;;  %v2071_v62 = vpop.xlane.xlu1 %2070  ;;  %v2068_v5 = vmul.f32 %v3430_v52, %v3430_v52 }
 0xc7f   :  { %v2081_v59 = vmul.f32 0.03125, %v2071_v62 }
 0xc80   :  { %v2086_v26 = vadd.f32 1e-05, %v2082_v1  ;;  %v2078_v6 = vsel %vm46_vm0, %v2068_v5, 0.0 }
 0xc81   :  { %v2085_v27 = vadd.f32 1e-05, %v2081_v59  ;;  %2079 = vadd.xlane.f32.xlu0 %v2078_v6  ;;  %v2120_v31 = vpop.permute.xlu0 %2119 }
 0xc82   :  { %2822 = vrsqrt.f32 %v2086_v26  ;;  %v2053_v60 = vpop.xlane.xlu1 %2052 }
 0xc83   :  { %2824 = vrsqrt.f32 %v2085_v27  ;;  %v2059_v28 = vmul.f32 0.03125, %v2053_v60 }
 0xc85   :  { %v3435_v7 = vsub.f32 %v2043_v12, %v2059_v28  ;;  %v2130_v24 = vpop.permute.xlu0 %2129 }
 0xc86   :  { %v2118_v18 = vpop.permute.xlu1 %2117 }
 0xc87   :  { %v2067_v35 = vmul.f32 %v3435_v7, %v3435_v7  ;;  %v2159_v56 = vsel %vm238_vm3, %v3102_v17, %v2118_v18  ;;  %v2160_v17 = vsel %vm238_vm3, %v3104_v19, %v2120_v31 }
 0xc89   :  { %v2075_v36 = vsel %vm46_vm0, %v2067_v35, 0.0  ;;  %v2136_v54 = vpop.permute.xlu0 %2135 }
 0xc8a   :  { %2076 = vadd.xlane.f32.xlu1 %v2075_v36  ;;  %v2124_v4 = vpop.permute.xlu1 %2123 }
 0xc8c   :  { %v2823_v11 = vpop.eup %2822 }
 0xc8d   :  { %v2825_v46 = vpop.eup %2824  ;;  %v2094_v42 = vmul.f32 %v2823_v11, %v2062_v0  ;;  %v2142_v55 = vpop.permute.xlu0 %2141 }
 0xc8e   :  { %v2093_v48 = vmul.f32 %v2825_v46, %v2061_v3  ;;  %v2126_v14 = vpop.permute.xlu1 %2125 }
 0xc8f   :  { %v2102_v49 = vmul.f32 %v3443_v44, %v2094_v42  ;;  %v2162_v16 = vsel %vm46_vm0, %v2160_v17, %v2126_v14 }
 0xc90   :  { %v2101_v41 = vmul.f32 %v3443_v44, %v2093_v48 }
 0xc91   :  { %v2110_v34 = vadd.f32 %v3446_v45, %v2102_v49 }
 0xc92   :  { %v2109_v29 = vadd.f32 %v3446_v45, %v2101_v41  ;;  %v2132_v51 = vpop.permute.xlu1 %2131 }
 0xc93   :  { %2114 = vst.msk [vmem:[#allocation2 + $0x8] sm:$0xff] %vm46_vm0, %v2110_v34  ;;  %v2165_v2 = vsel %vm2163_vm4, %v2162_v16, %v2132_v51 }
 0xc94   :  { %2113 = vst.msk [vmem:[#allocation2] sm:$0xff] %vm46_vm0, %v2109_v29 }
 0xc96   :  { %v2138_v39 = vpop.permute.xlu1 %2137 }
 0xc97   :  { %2147 = vrot.lane.b32.xlu0 %v3268_v10, %s2882_s25  ;;  %v2161_v10 = vsel %vm46_vm0, %v2159_v56, %v2124_v4  ;;  %s2891_s25 = smov [#allocation4]   ;;  %v2168_v3 = vsel %vm2166_vm5, %v2165_v2, %v2138_v39 }
 0xc98   :  { %v2164_v13 = vsel %vm2163_vm4, %v2161_v10, %v2130_v24  ;;  %s2197_s26 = sshll.u32 %s2891_s25, 4  ;;  %s2198_s26 = int_to_ptr.vmem [resolvable:$true] %s2197_s26 }
 0xc99   :  { %v2167_v57 = vsel %vm2166_vm5, %v2164_v13, %v2136_v54  ;;  %p2836_p1 = scmp.lt.s32.totalorder %s2198_s26, %s2198_s26 }
 0xc9a   :  { %v2144_v21 = vpop.permute.xlu1 %2143  ;;  %v2170_v43 = vsel %vm2169_vm6, %v2167_v57, %v2142_v55 }
 0xc9b   :  { %2155 = vrot.lane.b32.xlu1 %v3283_v33, %s2886_s29  ;;  %2153 = vrot.lane.b32.xlu0 %v3276_v30, %s2886_s29  ;;  %v2171_v50 = vsel %vm2169_vm6, %v2168_v3, %v2144_v21  ;;  %s2831_s29 = scalar_lea.vmem %s2198_s26, 256 }
 0xc9c   :  { %p2832_p0 = scmp.ne.s32.totalorder %s2198_s26, %s2831_s29  ;;  %p2837_p2 = scmp.lt.s32.totalorder %s2831_s29, %s2831_s29 }
 0xc9e   :  { %v2150_v61 = vpop.permute.xlu1 %2149  ;;  %p2838_p3 = por %p2837_p2, %p2836_p1 }
 0xc9f   :  { %v2174_v40 = vsel %vm2172_vm8, %v2171_v50, %v2150_v61 }
 0xca0   :  { %p2839_p4 = pnand %p2838_p3, %p2832_p0 }
 0xd0e   :  { %v2080_v33 = vpop.xlane.xlu0 %2079 }
 0xd0f   :  { %v2084_v30 = vmul.f32 0.03125, %v2080_v33 }
 0xd11   :  { %v2088_v32 = vadd.f32 1e-05, %v2084_v30 }
 0xd12   :  { %v2148_v58 = vpop.permute.xlu0 %2147 }
 0xd13   :  { %2826 = vrsqrt.f32 %v2088_v32  ;;  %v2173_v15 = vsel %vm2172_vm8, %v2170_v43, %v2148_v58 }
 0xd16   :  { %v2154_v47 = vpop.permute.xlu0 %2153 }
 0xd17   :  { %v2176_v63 = vsel %vm2175_vm7, %v2173_v15, %v2154_v47  ;;  %v2077_v0 = vpop.xlane.xlu1 %2076 }
 0xd18   :  { %2178 = vst [vmem:[#allocation4] sm:$0xff] %v2176_v63  ;;  %v2083_v37 = vmul.f32 0.03125, %v2077_v0 }
 0xd1a   :  { %v2087_v8 = vadd.f32 1e-05, %v2083_v37 }
 0xd1b   :  { %v2156_v19 = vpop.permute.xlu1 %2155 }
 0xd1c   :  { %2828 = vrsqrt.f32 %v2087_v8  ;;  %v2177_v9 = vsel %vm2175_vm7, %v2174_v40, %v2156_v19 }
 0xd1d   :  { %v2827_v12 = vpop.eup %2826  ;;  %2179 = vst [vmem:[#allocation4 + $0x8] sm:$0xff] %v2177_v9 }
 0xd1e   :  { %v2096_v25 = vmul.f32 %v2827_v12, %v3430_v52 }
 0xd1f   :  { %2842 = shalt.err (!%p2839_p4)
}
 0xd20   :  { %s2843_s27 = scalar_lea.hbm %s3512_s6, 256 }
 0xd21   :  { %p2844_p5 = scmp.ne.s32.totalorder %s3512_s6, %s2843_s27  ;;  %p2847_p6 = scmp.lt.u32.totalorder %s2843_s27, %s3512_s6 }
 0xd23   :  { %p2849_p7 = pnand %p2847_p6, %p2844_p5 }
 0xd25   :  { %2852 = shalt.err (!%p2849_p7)
}
 0xd26   :  { %s2892_s11 = smov 128   ;;  %s2893_s12 = smov 8   ;;  %v2104_v20 = vmul.f32 %v3443_v44, %v2096_v25  ;;  %v2829_v52 = vpop.eup %2828 }
 0xd27   :  { %2203 = dma.vmem_to_hbm [thread:$0]  %s2198_s26, 256, %s3512_s6, [#allocation5], %s2892_s11, %s2892_s11, %s2893_s12   ;;  %v2095_v53 = vmul.f32 %v2829_v52, %v3435_v7 }
 0xd28   :  { %v2112_v23 = vadd.f32 %v3446_v45, %v2104_v20  ;;  %s2894_s15 = smov [#allocation2]  }
 0xd29   :  { %s2185_s2 = sshll.u32 %s2894_s15, 4  ;;  %v2103_v1 = vmul.f32 %v3443_v44, %v2095_v53  ;;  %s2186_s2 = int_to_ptr.vmem [resolvable:$true] %s2185_s2 }
 0xd2a   :  { %2116 = vst.msk [vmem:[#allocation2 + $0x18] sm:$0xff] %vm46_vm0, %v2112_v23  ;;  %s2853_s16 = scalar_lea.vmem %s2186_s2, 512  ;;  %p2858_p9 = scmp.lt.s32.totalorder %s2186_s2, %s2186_s2 }
 0xd2b   :  { %v2111_v62 = vadd.f32 %v3446_v45, %v2103_v1  ;;  %p2854_p8 = scmp.ne.s32.totalorder %s2186_s2, %s2853_s16  ;;  %p2859_p10 = scmp.lt.s32.totalorder %s2853_s16, %s2853_s16 }
 0xd2d   :  { %2115 = vst.msk [vmem:[#allocation2 + $0x10] sm:$0xff] %vm46_vm0, %v2111_v62  ;;  %p2860_p11 = por %p2859_p10, %p2858_p9 }
 0xd2f   :  { %p2861_p12 = pnand %p2860_p11, %p2854_p8 }
 0xd31   :  { %2864 = shalt.err (!%p2861_p12)
}
 0xd32   :  { %s2865_s17 = scalar_lea.hbm %s3511_s5, 512 }
 0xd33   :  { %p2866_p13 = scmp.ne.s32.totalorder %s3511_s5, %s2865_s17  ;;  %p2869_p0 = scmp.lt.u32.totalorder %s2865_s17, %s3511_s5 }
 0xd35   :  { %p2871_p1 = pnand %p2869_p0, %p2866_p13 }
 0xd37   :  { %2874 = shalt.err (!%p2871_p1)
}
 0xd38   :  { %2191 = dma.vmem_to_hbm [thread:$0]  %s2186_s2, 512, %s3511_s5, [#allocation3], %s2892_s11, %s2892_s11, %s2893_s12  }
 0xd39   :  { %2875 = dma.done.wait [#allocation3], 512  }
 0xd3a   :  { %2876 = vsyncadd [#allocation3], 4294966784 }
 0xd3b   :  { %2877 = dma.done.wait [#allocation5], 256  }
 0xd3c   :  { %2878 = vsyncadd [#allocation5], 4294967040 }
 0xd3d   :  { %2210 = vsyncpa [#allocation3], 1 }
 0xd3e   :  { %2211 = vsyncpa [#allocation5], 1 }

</bundles_post_ra>
